<compile_context>
chip_gen: v6e
topology: v6e:2x2x1
jax: 0.10.0
libtpu: 0.0.40
codegen_flags: <defaults>
</compile_context>

<pallas_src>
import functools

import numpy as np
import jax
import jax.numpy as jnp
from jax import lax
from jax.experimental import pallas as pl
from jax.experimental.pallas import tpu as pltpu

NEG_SLOPE = 0.01   # nn.LeakyReLU default
BN_EPS = 1e-5      # nn.BatchNorm2d default


def _leaky(x):
    return jnp.where(x >= 0, x, NEG_SLOPE * x)


# ------------------------------ Pallas kernel -------------------------------

def block_kernel(x_ref, w1_ref, g_ref, be_ref, w2_ref, b2_ref, mask_ref, o_ref,
                 *, k, W, HW, H1, W1, N):
    """Whole Block fused, batch-fused flat-spatial implicit-GEMM layout.

    Shapes (all VMEM-resident, single invocation):
      x_ref:    (Cin, Lx)          bf16  NCHW flattened: col = n*HW + h*W + w,
                                         zero-padded on the right to width Lx
      w1_ref:   (k*k, Cmid, Cin)   bf16  conv1 taps, tap t = kh*k + kw
      g/be:     (Cmid, 1)          f32   BN gamma / beta
      w2_ref:   (Cout, k*k*Cmid)   bf16  conv2 im2col-flattened weights
      b2_ref:   (Cout, 1)          f32
      mask_ref: (1, Lt1)           f32   1.0 on valid conv1 columns
      o_ref:    (Cout, Lout=N*HW)  f32   conv2 output, same flat column layout

    Flat-map trick: a VALID conv output at (h, w) of image n lives at column
    n*HW + h*W + w and equals sum_t W_tap[t] @ x[:, col + s_t], s_t = kh*W+kw.
    Since HW >= L1 + max(s_t), the shifted slices never mix images at valid
    columns; garbage columns never feed valid outputs and are masked out of
    the BN statistics / cropped by the wrapper.
    """
    Cmid = w1_ref.shape[1]
    Lout = o_ref.shape[1]          # N*HW (lane-dense)
    Lt1 = mask_ref.shape[1]        # Lout + (k-1)*(W+1)

    xb = x_ref[...]                                   # (Cin, Lx) bf16
    w2 = w2_ref[...]                                  # (Cout, k*k*Cmid) bf16
    gamma = g_ref[...]                                # (Cmid, 1) f32
    beta = be_ref[...]
    b2 = b2_ref[...]
    maskf = mask_ref[...]                             # (1, Lt1) f32

    shifts = [(t // k) * W + (t % k) for t in range(k * k)]

    # --- conv1: k*k batch-fused shifted tap GEMMs, bf16 MXU, f32 accumulation.
    y1 = jnp.zeros((Cmid, Lt1), jnp.float32)
    for t, s in enumerate(shifts):
        y1 = y1 + jnp.dot(w1_ref[t], xb[:, s:s + Lt1],
                          preferred_element_type=jnp.float32)
    # conv1 bias elided: exactly cancelled by batch-statistic mean subtraction.
    # TODO(synk): restore the bias if eval-mode (running-stats) BN is ever used.

    # --- BatchNorm2d, training-mode batch statistics over the N*H1*W1 valid
    #     positions, single masked pass (var = E[y^2] - mean^2, biased).
    inv_count = 1.0 / float(N * H1 * W1)
    ym = y1 * maskf
    mean = jnp.sum(ym, axis=1, keepdims=True) * inv_count
    ex2 = jnp.sum(ym * y1, axis=1, keepdims=True) * inv_count
    var = jnp.maximum(ex2 - mean * mean, 0.0)
    scale = gamma * lax.rsqrt(var + BN_EPS)           # (Cmid, 1)
    shift = beta - mean * scale

    # --- LeakyReLU epilogue (one fused pass over the whole batch slab).
    a = _leaky(y1 * scale + shift).astype(jnp.bfloat16)        # (Cmid, Lt1)

    # --- conv2: ONE large-K GEMM.  In-VMEM im2col slab built from k*k shifted
    #     slices; each piece is Cmid=16 rows = one packed bf16 sublane tile,
    #     so the sublane concatenation is tile-aligned.
    a2 = jnp.concatenate([a[:, s:s + Lout] for s in shifts], axis=0)  # (k*k*Cmid, Lout)
    y2 = jnp.dot(w2, a2, preferred_element_type=jnp.float32) + b2     # (Cout, Lout)

    # Lane-dense, unmasked full-width store (Lout is a multiple of 128 here).
    o_ref[...] = _leaky(y2).astype(o_ref.dtype)


# ----------------------------- pallas_call glue ------------------------------

def block_forward(x_nchw, kernel_params, k):
    """One fused pallas_call for the whole Block. Input/output are NCHW f32."""
    w1_t, gamma, beta, w2_f, b2 = kernel_params
    N, Cin, H, W = x_nchw.shape
    Cout = w2_f.shape[0]
    HW = H * W
    H1, W1 = H - (k - 1), W - (k - 1)
    H2, W2 = H1 - (k - 1), W1 - (k - 1)
    L1 = (H1 - 1) * W + W1
    smax = (k - 1) * (W + 1)          # largest tap shift
    Lout = N * HW                     # kernel output width (512 here: 128-multiple)
    Lt1 = Lout + smax                 # conv1 / BN slab width
    Lx = Lt1 + smax                   # padded input slab width

    # NCHW f32 -> (Cin, N*H*W) bf16 flat slab (batch fused along lanes), then a
    # tiny right zero-pad so every in-kernel slab is computed at full width.
    x_slab = jnp.transpose(x_nchw, (1, 0, 2, 3)).reshape(Cin, Lout)
    x_slab = jnp.pad(x_slab, ((0, 0), (0, Lx - Lout))).astype(jnp.bfloat16)

    # Valid-column mask for the BN statistics (tiny host-built constant).
    cols = np.arange(Lt1)
    valid = (cols % W < W1) & (cols % HW < L1) & (cols < (N - 1) * HW + L1)
    maskf = jnp.asarray(valid.astype(np.float32)).reshape(1, Lt1)

    args = (x_slab, w1_t, gamma, beta, w2_f, b2, maskf)
    out_shape = jax.ShapeDtypeStruct((Cout, Lout), jnp.float32)
    out_flat = pl.pallas_call(
        functools.partial(block_kernel, k=k, W=W, HW=HW, H1=H1, W1=W1, N=N),
        out_shape=out_shape,
        grid=(1,),
        in_specs=[pl.BlockSpec(a.shape, lambda i, _nd=a.ndim: (0,) * _nd)
                  for a in args],
        out_specs=pl.BlockSpec(out_shape.shape, lambda i: (0, 0)),
        compiler_params=pltpu.CompilerParams(
            dimension_semantics=("arbitrary",)),
    )(*args)

    # Flat (row stride W, image stride HW) -> NCHW valid region: reshape+crop.
    out = out_flat.reshape(Cout, N, H, W)[:, :, :H2, :W2]
    return jnp.transpose(out, (1, 0, 2, 3))


# ------------------------------- parameters ---------------------------------

def init_params(cin, cout, k, key):
    """Deterministic synthetic parameters in PyTorch layout + kernel layout."""
    cmid = 2 * cout
    k1, k2, k3, k4, k5, k6 = jax.random.split(key, 6)
    w1_pt = jax.random.normal(k1, (cmid, cin, k, k), jnp.float32) * 0.2
    b1 = jax.random.normal(k2, (cmid,), jnp.float32) * 0.1
    w2_pt = jax.random.normal(k3, (cout, cmid, k, k), jnp.float32) * 0.2
    b2 = jax.random.normal(k4, (cout,), jnp.float32) * 0.1
    gamma = 1.0 + 0.1 * jax.random.normal(k5, (cmid,), jnp.float32)
    beta = 0.1 * jax.random.normal(k6, (cmid,), jnp.float32)
    # conv1: tap-stacked (k*k, Cmid, Cin); conv2: im2col-flat (Cout, k*k*Cmid),
    # row order t*Cmid + cmid with t = kh*k + kw, matching the kernel's concat.
    w1_t = jnp.transpose(w1_pt, (2, 3, 0, 1)).reshape(k * k, cmid, cin).astype(jnp.bfloat16)
    w2_f = jnp.transpose(w2_pt, (0, 2, 3, 1)).reshape(cout, k * k * cmid).astype(jnp.bfloat16)
    return {
        "pt": (w1_pt, b1, gamma, beta, w2_pt, b2),
        "kernel": (w1_t, gamma.reshape(-1, 1), beta.reshape(-1, 1), w2_f,
                   b2.reshape(-1, 1)),
    }


# ---------------------------- pure-JAX reference -----------------------------

def ref_block(x, w1, b1, gamma, beta, w2, b2):
    dn = ("NCHW", "OIHW", "NCHW")
    y = lax.conv_general_dilated(x, w1, (1, 1), "VALID", dimension_numbers=dn,
                                 precision=lax.Precision.HIGHEST)
    y = y + b1[None, :, None, None]
    mean = jnp.mean(y, axis=(0, 2, 3), keepdims=True)
    var = jnp.mean(jnp.square(y - mean), axis=(0, 2, 3), keepdims=True)
    y = (y - mean) / jnp.sqrt(var + BN_EPS)
    y = y * gamma[None, :, None, None] + beta[None, :, None, None]
    y = jnp.where(y >= 0, y, NEG_SLOPE * y)
    z = lax.conv_general_dilated(y, w2, (1, 1), "VALID", dimension_numbers=dn,
                                 precision=lax.Precision.HIGHEST)
    z = z + b2[None, :, None, None]
    return jnp.where(z >= 0, z, NEG_SLOPE * z)


# ---------------------------------- main -------------------------------------

if __name__ == "__main__":
    N, Cin, Cout, H, W, k = 2, 4, 8, 16, 16, 3   # Block(4, 8, kernel_size=3)

    key = jax.random.PRNGKey(0)
    kx, kp = jax.random.split(key)
    x = jax.random.normal(kx, (N, Cin, H, W), jnp.float32)   # NCHW, like PyTorch
    params = init_params(Cin, Cout, k, kp)

    fwd = jax.jit(lambda xx, pp: block_forward(xx, pp, k))
    out = jax.block_until_ready(fwd(x, params["kernel"]))

    ref = ref_block(x, *params["pt"])
    expected = (N, Cout, H - 2 * (k - 1), W - 2 * (k - 1))
    assert out.shape == ref.shape == expected, (out.shape, ref.shape, expected)
    # Kernel uses bf16 MXU inputs with f32 accumulation and single-pass BN
    # stats; reference is all-f32 HIGHEST precision -> allow bf16-level slack.
    np.testing.assert_allclose(np.asarray(out), np.asarray(ref),
                               rtol=5e-2, atol=5e-2)

    print("KERNEL_OK")
</pallas_src>

<mosaic_0001>
module attributes {stable_mosaic.version = 11 : i64} {
  func.func @block_kernel(%arg0: i32, %arg1: memref<4x580xbf16, #tpu.memory_space<vmem>>, %arg2: memref<9x16x4xbf16, #tpu.memory_space<vmem>>, %arg3: memref<16x1xf32, #tpu.memory_space<vmem>>, %arg4: memref<16x1xf32, #tpu.memory_space<vmem>>, %arg5: memref<8x144xbf16, #tpu.memory_space<vmem>>, %arg6: memref<8x1xf32, #tpu.memory_space<vmem>>, %arg7: memref<1x546xf32, #tpu.memory_space<vmem>>, %arg8: memref<8x512xf32, #tpu.memory_space<vmem>>) attributes {dimension_semantics = [#tpu.dimension_semantics<arbitrary>], iteration_bounds = array<i64: 1>, scalar_prefetch = 0 : i64, scratch_operands = 0 : i64, tpu.core_type = #tpu.core_type<tc>, window_params = [{pipeline_mode = #tpu.pipeline_mode<synchronous>, transform_indices = @transform_0, window_bounds = array<i64: 4, 580>}, {pipeline_mode = #tpu.pipeline_mode<synchronous>, transform_indices = @transform_1, window_bounds = array<i64: 9, 16, 4>}, {pipeline_mode = #tpu.pipeline_mode<synchronous>, transform_indices = @transform_2, window_bounds = array<i64: 16, 1>}, {pipeline_mode = #tpu.pipeline_mode<synchronous>, transform_indices = @transform_3, window_bounds = array<i64: 16, 1>}, {pipeline_mode = #tpu.pipeline_mode<synchronous>, transform_indices = @transform_4, window_bounds = array<i64: 8, 144>}, {pipeline_mode = #tpu.pipeline_mode<synchronous>, transform_indices = @transform_5, window_bounds = array<i64: 8, 1>}, {pipeline_mode = #tpu.pipeline_mode<synchronous>, transform_indices = @transform_6, window_bounds = array<i64: 1, 546>}, {pipeline_mode = #tpu.pipeline_mode<synchronous>, transform_indices = @transform_7, window_bounds = array<i64: 8, 512>}]} {
    %c0 = arith.constant 0 : index
    %c0_0 = arith.constant 0 : index
    %0 = vector.load %arg1[%c0, %c0_0] : memref<4x580xbf16, #tpu.memory_space<vmem>>, vector<4x580xbf16>
    %c0_1 = arith.constant 0 : index
    %c0_2 = arith.constant 0 : index
    %1 = vector.load %arg5[%c0_1, %c0_2] : memref<8x144xbf16, #tpu.memory_space<vmem>>, vector<8x144xbf16>
    %c0_3 = arith.constant 0 : index
    %c0_4 = arith.constant 0 : index
    %2 = vector.load %arg3[%c0_3, %c0_4] : memref<16x1xf32, #tpu.memory_space<vmem>>, vector<16x1xf32>
    %c0_5 = arith.constant 0 : index
    %c0_6 = arith.constant 0 : index
    %3 = vector.load %arg4[%c0_5, %c0_6] : memref<16x1xf32, #tpu.memory_space<vmem>>, vector<16x1xf32>
    %c0_7 = arith.constant 0 : index
    %c0_8 = arith.constant 0 : index
    %4 = vector.load %arg6[%c0_7, %c0_8] : memref<8x1xf32, #tpu.memory_space<vmem>>, vector<8x1xf32>
    %c0_9 = arith.constant 0 : index
    %c0_10 = arith.constant 0 : index
    %5 = vector.load %arg7[%c0_9, %c0_10] : memref<1x546xf32, #tpu.memory_space<vmem>>, vector<1x546xf32>
    %cst = arith.constant 0.000000e+00 : f32
    %6 = vector.broadcast %cst : f32 to vector<16x546xf32>
    %c0_11 = arith.constant 0 : index
    %c0_12 = arith.constant 0 : index
    %c0_13 = arith.constant 0 : index
    %7 = vector.load %arg2[%c0_11, %c0_12, %c0_13] : memref<9x16x4xbf16, #tpu.memory_space<vmem>>, vector<1x16x4xbf16>
    %8 = vector.shape_cast %7 : vector<1x16x4xbf16> to vector<16x4xbf16>
    %9 = vector.extract_strided_slice %0 {offsets = [0, 0], sizes = [4, 546], strides = [1, 1]} : vector<4x580xbf16> to vector<4x546xbf16>
    %cst_14 = arith.constant dense<0.000000e+00> : vector<16x546xf32>
    %10 = tpu.matmul %8, %9, %cst_14 {dimension_numbers = #tpu.dot_dimension_numbers<[1], [0], [0], [1], [0, 0, 1, 1], [], []>} : vector<16x4xbf16>, vector<4x546xbf16>, vector<16x546xf32> -> vector<16x546xf32>
    %11 = arith.addf %6, %10 : vector<16x546xf32>
    %c1 = arith.constant 1 : index
    %c0_15 = arith.constant 0 : index
    %c0_16 = arith.constant 0 : index
    %12 = vector.load %arg2[%c1, %c0_15, %c0_16] : memref<9x16x4xbf16, #tpu.memory_space<vmem>>, vector<1x16x4xbf16>
    %13 = vector.shape_cast %12 : vector<1x16x4xbf16> to vector<16x4xbf16>
    %14 = vector.extract_strided_slice %0 {offsets = [0, 1], sizes = [4, 546], strides = [1, 1]} : vector<4x580xbf16> to vector<4x546xbf16>
    %cst_17 = arith.constant dense<0.000000e+00> : vector<16x546xf32>
    %15 = tpu.matmul %13, %14, %cst_17 {dimension_numbers = #tpu.dot_dimension_numbers<[1], [0], [0], [1], [0, 0, 1, 1], [], []>} : vector<16x4xbf16>, vector<4x546xbf16>, vector<16x546xf32> -> vector<16x546xf32>
    %16 = arith.addf %11, %15 : vector<16x546xf32>
    %c2 = arith.constant 2 : index
    %c0_18 = arith.constant 0 : index
    %c0_19 = arith.constant 0 : index
    %17 = vector.load %arg2[%c2, %c0_18, %c0_19] : memref<9x16x4xbf16, #tpu.memory_space<vmem>>, vector<1x16x4xbf16>
    %18 = vector.shape_cast %17 : vector<1x16x4xbf16> to vector<16x4xbf16>
    %19 = vector.extract_strided_slice %0 {offsets = [0, 2], sizes = [4, 546], strides = [1, 1]} : vector<4x580xbf16> to vector<4x546xbf16>
    %cst_20 = arith.constant dense<0.000000e+00> : vector<16x546xf32>
    %20 = tpu.matmul %18, %19, %cst_20 {dimension_numbers = #tpu.dot_dimension_numbers<[1], [0], [0], [1], [0, 0, 1, 1], [], []>} : vector<16x4xbf16>, vector<4x546xbf16>, vector<16x546xf32> -> vector<16x546xf32>
    %21 = arith.addf %16, %20 : vector<16x546xf32>
    %c3 = arith.constant 3 : index
    %c0_21 = arith.constant 0 : index
    %c0_22 = arith.constant 0 : index
    %22 = vector.load %arg2[%c3, %c0_21, %c0_22] : memref<9x16x4xbf16, #tpu.memory_space<vmem>>, vector<1x16x4xbf16>
    %23 = vector.shape_cast %22 : vector<1x16x4xbf16> to vector<16x4xbf16>
    %24 = vector.extract_strided_slice %0 {offsets = [0, 16], sizes = [4, 546], strides = [1, 1]} : vector<4x580xbf16> to vector<4x546xbf16>
    %cst_23 = arith.constant dense<0.000000e+00> : vector<16x546xf32>
    %25 = tpu.matmul %23, %24, %cst_23 {dimension_numbers = #tpu.dot_dimension_numbers<[1], [0], [0], [1], [0, 0, 1, 1], [], []>} : vector<16x4xbf16>, vector<4x546xbf16>, vector<16x546xf32> -> vector<16x546xf32>
    %26 = arith.addf %21, %25 : vector<16x546xf32>
    %c4 = arith.constant 4 : index
    %c0_24 = arith.constant 0 : index
    %c0_25 = arith.constant 0 : index
    %27 = vector.load %arg2[%c4, %c0_24, %c0_25] : memref<9x16x4xbf16, #tpu.memory_space<vmem>>, vector<1x16x4xbf16>
    %28 = vector.shape_cast %27 : vector<1x16x4xbf16> to vector<16x4xbf16>
    %29 = vector.extract_strided_slice %0 {offsets = [0, 17], sizes = [4, 546], strides = [1, 1]} : vector<4x580xbf16> to vector<4x546xbf16>
    %cst_26 = arith.constant dense<0.000000e+00> : vector<16x546xf32>
    %30 = tpu.matmul %28, %29, %cst_26 {dimension_numbers = #tpu.dot_dimension_numbers<[1], [0], [0], [1], [0, 0, 1, 1], [], []>} : vector<16x4xbf16>, vector<4x546xbf16>, vector<16x546xf32> -> vector<16x546xf32>
    %31 = arith.addf %26, %30 : vector<16x546xf32>
    %c5 = arith.constant 5 : index
    %c0_27 = arith.constant 0 : index
    %c0_28 = arith.constant 0 : index
    %32 = vector.load %arg2[%c5, %c0_27, %c0_28] : memref<9x16x4xbf16, #tpu.memory_space<vmem>>, vector<1x16x4xbf16>
    %33 = vector.shape_cast %32 : vector<1x16x4xbf16> to vector<16x4xbf16>
    %34 = vector.extract_strided_slice %0 {offsets = [0, 18], sizes = [4, 546], strides = [1, 1]} : vector<4x580xbf16> to vector<4x546xbf16>
    %cst_29 = arith.constant dense<0.000000e+00> : vector<16x546xf32>
    %35 = tpu.matmul %33, %34, %cst_29 {dimension_numbers = #tpu.dot_dimension_numbers<[1], [0], [0], [1], [0, 0, 1, 1], [], []>} : vector<16x4xbf16>, vector<4x546xbf16>, vector<16x546xf32> -> vector<16x546xf32>
    %36 = arith.addf %31, %35 : vector<16x546xf32>
    %c6 = arith.constant 6 : index
    %c0_30 = arith.constant 0 : index
    %c0_31 = arith.constant 0 : index
    %37 = vector.load %arg2[%c6, %c0_30, %c0_31] : memref<9x16x4xbf16, #tpu.memory_space<vmem>>, vector<1x16x4xbf16>
    %38 = vector.shape_cast %37 : vector<1x16x4xbf16> to vector<16x4xbf16>
    %39 = vector.extract_strided_slice %0 {offsets = [0, 32], sizes = [4, 546], strides = [1, 1]} : vector<4x580xbf16> to vector<4x546xbf16>
    %cst_32 = arith.constant dense<0.000000e+00> : vector<16x546xf32>
    %40 = tpu.matmul %38, %39, %cst_32 {dimension_numbers = #tpu.dot_dimension_numbers<[1], [0], [0], [1], [0, 0, 1, 1], [], []>} : vector<16x4xbf16>, vector<4x546xbf16>, vector<16x546xf32> -> vector<16x546xf32>
    %41 = arith.addf %36, %40 : vector<16x546xf32>
    %c7 = arith.constant 7 : index
    %c0_33 = arith.constant 0 : index
    %c0_34 = arith.constant 0 : index
    %42 = vector.load %arg2[%c7, %c0_33, %c0_34] : memref<9x16x4xbf16, #tpu.memory_space<vmem>>, vector<1x16x4xbf16>
    %43 = vector.shape_cast %42 : vector<1x16x4xbf16> to vector<16x4xbf16>
    %44 = vector.extract_strided_slice %0 {offsets = [0, 33], sizes = [4, 546], strides = [1, 1]} : vector<4x580xbf16> to vector<4x546xbf16>
    %cst_35 = arith.constant dense<0.000000e+00> : vector<16x546xf32>
    %45 = tpu.matmul %43, %44, %cst_35 {dimension_numbers = #tpu.dot_dimension_numbers<[1], [0], [0], [1], [0, 0, 1, 1], [], []>} : vector<16x4xbf16>, vector<4x546xbf16>, vector<16x546xf32> -> vector<16x546xf32>
    %46 = arith.addf %41, %45 : vector<16x546xf32>
    %c8 = arith.constant 8 : index
    %c0_36 = arith.constant 0 : index
    %c0_37 = arith.constant 0 : index
    %47 = vector.load %arg2[%c8, %c0_36, %c0_37] : memref<9x16x4xbf16, #tpu.memory_space<vmem>>, vector<1x16x4xbf16>
    %48 = vector.shape_cast %47 : vector<1x16x4xbf16> to vector<16x4xbf16>
    %49 = vector.extract_strided_slice %0 {offsets = [0, 34], sizes = [4, 546], strides = [1, 1]} : vector<4x580xbf16> to vector<4x546xbf16>
    %cst_38 = arith.constant dense<0.000000e+00> : vector<16x546xf32>
    %50 = tpu.matmul %48, %49, %cst_38 {dimension_numbers = #tpu.dot_dimension_numbers<[1], [0], [0], [1], [0, 0, 1, 1], [], []>} : vector<16x4xbf16>, vector<4x546xbf16>, vector<16x546xf32> -> vector<16x546xf32>
    %51 = arith.addf %46, %50 : vector<16x546xf32>
    %52 = vector.broadcast %5 : vector<1x546xf32> to vector<16x546xf32>
    %53 = arith.mulf %51, %52 : vector<16x546xf32>
    %cst_39 = arith.constant dense<0.000000e+00> : vector<16xf32>
    %54 = vector.multi_reduction <add>, %53, %cst_39 [1] : vector<16x546xf32> to vector<16xf32>
    %55 = vector.shape_cast %54 : vector<16xf32> to vector<16x1xf32>
    %cst_40 = arith.constant 0.00255102036 : f32
    %56 = vector.broadcast %cst_40 : f32 to vector<16x1xf32>
    %57 = arith.mulf %55, %56 : vector<16x1xf32>
    %58 = arith.mulf %53, %51 : vector<16x546xf32>
    %cst_41 = arith.constant dense<0.000000e+00> : vector<16xf32>
    %59 = vector.multi_reduction <add>, %58, %cst_41 [1] : vector<16x546xf32> to vector<16xf32>
    %60 = vector.shape_cast %59 : vector<16xf32> to vector<16x1xf32>
    %cst_42 = arith.constant 0.00255102036 : f32
    %61 = vector.broadcast %cst_42 : f32 to vector<16x1xf32>
    %62 = arith.mulf %60, %61 : vector<16x1xf32>
    %63 = arith.mulf %57, %57 : vector<16x1xf32>
    %64 = arith.subf %62, %63 : vector<16x1xf32>
    %cst_43 = arith.constant 0.000000e+00 : f32
    %65 = vector.broadcast %cst_43 : f32 to vector<16x1xf32>
    %66 = arith.maximumf %64, %65 : vector<16x1xf32>
    %cst_44 = arith.constant 9.99999974E-6 : f32
    %67 = vector.broadcast %cst_44 : f32 to vector<16x1xf32>
    %68 = arith.addf %66, %67 : vector<16x1xf32>
    %69 = math.rsqrt %68 : vector<16x1xf32>
    %70 = arith.mulf %2, %69 : vector<16x1xf32>
    %71 = arith.mulf %57, %70 : vector<16x1xf32>
    %72 = arith.subf %3, %71 : vector<16x1xf32>
    %73 = vector.broadcast %70 : vector<16x1xf32> to vector<16x546xf32>
    %74 = arith.mulf %51, %73 : vector<16x546xf32>
    %75 = vector.broadcast %72 : vector<16x1xf32> to vector<16x546xf32>
    %76 = arith.addf %74, %75 : vector<16x546xf32>
    %cst_45 = arith.constant 0.000000e+00 : f32
    %77 = vector.broadcast %cst_45 : f32 to vector<16x546xf32>
    %78 = arith.cmpf oge, %76, %77 : vector<16x546xf32>
    %cst_46 = arith.constant 0.00999999977 : f32
    %79 = vector.broadcast %cst_46 : f32 to vector<16x546xf32>
    %80 = arith.mulf %79, %76 : vector<16x546xf32>
    %81 = arith.select %78, %76, %80 : vector<16x546xi1>, vector<16x546xf32>
    %82 = arith.truncf %81 : vector<16x546xf32> to vector<16x546xbf16>
    %83 = vector.extract_strided_slice %82 {offsets = [0, 0], sizes = [16, 512], strides = [1, 1]} : vector<16x546xbf16> to vector<16x512xbf16>
    %84 = vector.extract_strided_slice %82 {offsets = [0, 1], sizes = [16, 512], strides = [1, 1]} : vector<16x546xbf16> to vector<16x512xbf16>
    %85 = vector.extract_strided_slice %82 {offsets = [0, 2], sizes = [16, 512], strides = [1, 1]} : vector<16x546xbf16> to vector<16x512xbf16>
    %86 = vector.extract_strided_slice %82 {offsets = [0, 16], sizes = [16, 512], strides = [1, 1]} : vector<16x546xbf16> to vector<16x512xbf16>
    %87 = vector.extract_strided_slice %82 {offsets = [0, 17], sizes = [16, 512], strides = [1, 1]} : vector<16x546xbf16> to vector<16x512xbf16>
    %88 = vector.extract_strided_slice %82 {offsets = [0, 18], sizes = [16, 512], strides = [1, 1]} : vector<16x546xbf16> to vector<16x512xbf16>
    %89 = vector.extract_strided_slice %82 {offsets = [0, 32], sizes = [16, 512], strides = [1, 1]} : vector<16x546xbf16> to vector<16x512xbf16>
    %90 = vector.extract_strided_slice %82 {offsets = [0, 33], sizes = [16, 512], strides = [1, 1]} : vector<16x546xbf16> to vector<16x512xbf16>
    %91 = vector.extract_strided_slice %82 {offsets = [0, 34], sizes = [16, 512], strides = [1, 1]} : vector<16x546xbf16> to vector<16x512xbf16>
    %92 = tpu.concatenate %83, %84, %85, %86, %87, %88, %89, %90, %91 in 0 : vector<16x512xbf16>, vector<16x512xbf16>, vector<16x512xbf16>, vector<16x512xbf16>, vector<16x512xbf16>, vector<16x512xbf16>, vector<16x512xbf16>, vector<16x512xbf16>, vector<16x512xbf16> -> vector<144x512xbf16>
    %cst_47 = arith.constant dense<0.000000e+00> : vector<8x512xf32>
    %93 = tpu.matmul %1, %92, %cst_47 {dimension_numbers = #tpu.dot_dimension_numbers<[1], [0], [0], [1], [0, 0, 1, 1], [], []>} : vector<8x144xbf16>, vector<144x512xbf16>, vector<8x512xf32> -> vector<8x512xf32>
    %94 = vector.broadcast %4 : vector<8x1xf32> to vector<8x512xf32>
    %95 = arith.addf %93, %94 : vector<8x512xf32>
    %cst_48 = arith.constant 0.000000e+00 : f32
    %96 = vector.broadcast %cst_48 : f32 to vector<8x512xf32>
    %97 = arith.cmpf oge, %95, %96 : vector<8x512xf32>
    %cst_49 = arith.constant 0.00999999977 : f32
    %98 = vector.broadcast %cst_49 : f32 to vector<8x512xf32>
    %99 = arith.mulf %98, %95 : vector<8x512xf32>
    %100 = arith.select %97, %95, %99 : vector<8x512xi1>, vector<8x512xf32>
    %c0_50 = arith.constant 0 : index
    %c0_51 = arith.constant 0 : index
    %101 = vector.load %arg8[%c0_50, %c0_51] : memref<8x512xf32, #tpu.memory_space<vmem>>, vector<8x512xf32>
    tpu.vector_store %arg8[%c0_50, %c0_51], %100 {strides = array<i32>} : memref<8x512xf32, #tpu.memory_space<vmem>>, vector<8x512xf32>,
    return
  }
  func.func @transform_0(%arg0: i32) -> (i32, i32) {
    %c0_i32 = arith.constant 0 : i32
    %c0_i32_0 = arith.constant 0 : i32
    %c0_i32_1 = arith.constant 0 : i32
    return %c0_i32, %c0_i32_0 : i32, i32
  }
  func.func @transform_1(%arg0: i32) -> (i32, i32, i32) {
    %c0_i32 = arith.constant 0 : i32
    %c0_i32_0 = arith.constant 0 : i32
    %c0_i32_1 = arith.constant 0 : i32
    %c0_i32_2 = arith.constant 0 : i32
    return %c0_i32, %c0_i32_0, %c0_i32_1 : i32, i32, i32
  }
  func.func @transform_2(%arg0: i32) -> (i32, i32) {
    %c0_i32 = arith.constant 0 : i32
    %c0_i32_0 = arith.constant 0 : i32
    %c0_i32_1 = arith.constant 0 : i32
    return %c0_i32, %c0_i32_0 : i32, i32
  }
  func.func @transform_3(%arg0: i32) -> (i32, i32) {
    %c0_i32 = arith.constant 0 : i32
    %c0_i32_0 = arith.constant 0 : i32
    %c0_i32_1 = arith.constant 0 : i32
    return %c0_i32, %c0_i32_0 : i32, i32
  }
  func.func @transform_4(%arg0: i32) -> (i32, i32) {
    %c0_i32 = arith.constant 0 : i32
    %c0_i32_0 = arith.constant 0 : i32
    %c0_i32_1 = arith.constant 0 : i32
    return %c0_i32, %c0_i32_0 : i32, i32
  }
  func.func @transform_5(%arg0: i32) -> (i32, i32) {
    %c0_i32 = arith.constant 0 : i32
    %c0_i32_0 = arith.constant 0 : i32
    %c0_i32_1 = arith.constant 0 : i32
    return %c0_i32, %c0_i32_0 : i32, i32
  }
  func.func @transform_6(%arg0: i32) -> (i32, i32) {
    %c0_i32 = arith.constant 0 : i32
    %c0_i32_0 = arith.constant 0 : i32
    %c0_i32_1 = arith.constant 0 : i32
    return %c0_i32, %c0_i32_0 : i32, i32
  }
  func.func @transform_7(%arg0: i32) -> (i32, i32) {
    %c0_i32 = arith.constant 0 : i32
    %c0_i32_0 = arith.constant 0 : i32
    %c0_i32_1 = arith.constant 0 : i32
    return %c0_i32, %c0_i32_0 : i32, i32
  }
}

</mosaic_0001>

<bundles_post_ra>
// kernel: _lambda_.1
= control target key start
LH: loop header
LB: loop body
LE: loop exit
PB: predicated region body
PF: predicated region fallthrough
CT: control target
= control target key end

     0   :  { %v52_v0 = vlaneseq  ;;  %v2243_v2 = vmov 1983009808   ;;  %v2244_v7 = vmov 0   ;;  %s2245_s26 = smov 127   ;;  %s2246_s29 = smov 126   ;;  %vm82_vm0 = vcmask 1039360   ;;  %s2986_s0 = inlined_call_operand.vmem [shape: bf16[4,580], index: 0, kind: input, shape index: {}]   ;;  %s2987_s1 = inlined_call_operand.vmem [shape: bf16[9,16,4], index: 1, kind: input, shape index: {}]   ;;  %s2988_s6 = inlined_call_operand.vmem [shape: f32[1,546], index: 6, kind: input, shape index: {}]   ;;  %s2989_s2 = inlined_call_operand.vmem [shape: f32[16,1], index: 2, kind: input, shape index: {}]   ;;  %s2990_s3 = inlined_call_operand.vmem [shape: f32[16,1], index: 3, kind: input, shape index: {}]   ;;  %s2991_s5 = inlined_call_operand.vmem [shape: f32[8,1], index: 5, kind: input, shape index: {}]   ;;  %s2992_s4 = inlined_call_operand.vmem [shape: bf16[8,144], index: 4, kind: input, shape index: {}]   ;;  %s2993_s7 = inlined_call_operand.vmem [shape: f32[8,512], index: 7, kind: output, shape index: {}]  }
   0x1   :  { %v27_v1 = vld [vmem:[%s2986_s0] sm:$0xff]  ;;  %v50_v3 = vunpack.c.l.s4 %v2243_v2  ;;  %139 = vmatprep.mubr.bf16.mxu0 %v2244_v7  ;;  %182 = vmatprep.mubr.bf16.mxu1 %v2244_v7  ;;  %v2328_v13 = vld.sshfl [vmem:[%s2986_s0 + $0x8] sm:$0x3 pattern:$0x76325410]  ;;  %s2247_s0 = smov 112  }
   0x2   :  { %v2298_v4 = vshrl.u32 %v52_v0, 7  ;;  %v48_v6 = vcombine.high %v27_v1, %v27_v1  ;;  %2225 = vset.pattern.permute.xlu1 %v2244_v7  ;;  %2226 = vset.pattern.permute.xlu0 %v2244_v7  ;;  %s2248_s30 = smov 111   ;;  %s2249_s8 = smov 110   ;;  %vm91_vm1 = vcmask 1041408   ;;  %v2228_v21 = vld [vmem:[%s2987_s1 + $0x8] sm:$0xff]   ;;  %vm87_vm2 = vcmask 31744  }
   0x3   :  { %v51_v5 = vunpack.c.0.s8 %v50_v3  ;;  %s2250_s9 = smov 96   ;;  %s2251_s10 = smov 95   ;;  %v2253_v24 = vmov 0.0   ;;  %vm2254_vm3 = vmmov 0   ;;  %vm402_vm4 = vcmask 1031168   ;;  %v2229_v36 = vld [vmem:[%s2987_s1] sm:$0xff]  }
   0x4   :  { %s2252_s11 = smov 94   ;;  %v255_v37 = vsel %vm91_vm1, %v2328_v13, 0  ;;  %vm580_vm5 = vcmask 916480   ;;  %v2230_v50 = vld [vmem:[%s2987_s1 + $0x10] sm:$0xff]   ;;  %vm758_vm6 = vcmask 908288   ;;  %v2231_v0 = vld [vmem:[%s2987_s1 + $0x18] sm:$0xff]  }
   0x5   :  { %v54_v8 = vsub.s32 %v51_v5, %v2298_v4  ;;  %vm936_vm7 = vcmask 900096   ;;  %vm1114_vm8 = vcmask 785408   ;;  %vm1292_vm9 = vcmask 777216  }
   0x6   :  { %vm1470_vm10 = vcmask 769024   ;;  %vm1669_vm11 = vcmask 277504  }
   0x7   :  { %v2305_v9 = vrot.slane %v27_v1, %v54_v8  ;;  %v2307_v10 = vrot.slane %v48_v6, %v54_v8 }
   0x9   :  { %72 = vrot.lane.b32.xlu0 %v2305_v9, %s2245_s26  ;;  %76 = vrot.lane.b32.xlu1 %v2307_v10, %s2245_s26  ;;  %v2315_v11 = vcombine.high %v2305_v9, %v2305_v9  ;;  %v2319_v12 = vcombine.high %v2307_v10, %v2307_v10  ;;  %v243_v29 = vsel %vm91_vm1, %v2305_v9, 0  ;;  %v249_v32 = vsel %vm91_vm1, %v2307_v10, 0 }
   0xd   :  { %74 = vrot.lane.b32.xlu0 %v2315_v11, %s2245_s26  ;;  %78 = vrot.lane.b32.xlu1 %v2319_v12, %s2245_s26 }
  0x11   :  { %80 = vrot.lane.b32.xlu0 %v2328_v13, %s2245_s26  ;;  %392 = vrot.lane.b32.xlu1 %v2305_v9, %s2246_s29 }
  0x15   :  { %394 = vrot.lane.b32.xlu0 %v2315_v11, %s2246_s29  ;;  %396 = vrot.lane.b32.xlu1 %v2307_v10, %s2246_s29 }
  0x19   :  { %398 = vrot.lane.b32.xlu0 %v2319_v12, %s2246_s29  ;;  %400 = vrot.lane.b32.xlu1 %v2328_v13, %s2246_s29 }
  0x1d   :  { %570 = vrot.lane.b32.xlu0 %v2305_v9, %s2247_s0  ;;  %572 = vrot.lane.b32.xlu1 %v2315_v11, %s2247_s0 }
  0x21   :  { %574 = vrot.lane.b32.xlu0 %v2307_v10, %s2247_s0  ;;  %576 = vrot.lane.b32.xlu1 %v2319_v12, %s2247_s0 }
  0x25   :  { %578 = vrot.lane.b32.xlu0 %v2328_v13, %s2247_s0  ;;  %748 = vrot.lane.b32.xlu1 %v2305_v9, %s2248_s30 }
  0x29   :  { %750 = vrot.lane.b32.xlu0 %v2315_v11, %s2248_s30  ;;  %752 = vrot.lane.b32.xlu1 %v2307_v10, %s2248_s30 }
  0x2d   :  { %754 = vrot.lane.b32.xlu0 %v2319_v12, %s2248_s30  ;;  %756 = vrot.lane.b32.xlu1 %v2328_v13, %s2248_s30 }
  0x31   :  { %926 = vrot.lane.b32.xlu0 %v2305_v9, %s2249_s8  ;;  %928 = vrot.lane.b32.xlu1 %v2315_v11, %s2249_s8 }
  0x35   :  { %930 = vrot.lane.b32.xlu0 %v2307_v10, %s2249_s8  ;;  %932 = vrot.lane.b32.xlu1 %v2319_v12, %s2249_s8 }
  0x39   :  { %934 = vrot.lane.b32.xlu0 %v2328_v13, %s2249_s8  ;;  %1104 = vrot.lane.b32.xlu1 %v2305_v9, %s2250_s9 }
  0x3d   :  { %1106 = vrot.lane.b32.xlu0 %v2315_v11, %s2250_s9  ;;  %1108 = vrot.lane.b32.xlu1 %v2307_v10, %s2250_s9 }
  0x41   :  { %1110 = vrot.lane.b32.xlu0 %v2319_v12, %s2250_s9  ;;  %1112 = vrot.lane.b32.xlu1 %v2328_v13, %s2250_s9 }
  0x45   :  { %1282 = vrot.lane.b32.xlu0 %v2305_v9, %s2251_s10  ;;  %1284 = vrot.lane.b32.xlu1 %v2315_v11, %s2251_s10 }
  0x49   :  { %1286 = vrot.lane.b32.xlu0 %v2307_v10, %s2251_s10  ;;  %1288 = vrot.lane.b32.xlu1 %v2319_v12, %s2251_s10 }
  0x4d   :  { %1290 = vrot.lane.b32.xlu0 %v2328_v13, %s2251_s10  ;;  %1460 = vrot.lane.b32.xlu1 %v2305_v9, %s2252_s11 }
  0x51   :  { %1462 = vrot.lane.b32.xlu0 %v2315_v11, %s2252_s11  ;;  %1464 = vrot.lane.b32.xlu1 %v2307_v10, %s2252_s11 }
  0x55   :  { %1466 = vrot.lane.b32.xlu0 %v2319_v12, %s2252_s11  ;;  %1468 = vrot.lane.b32.xlu1 %v2328_v13, %s2252_s11 }
  0x7b   :  { %v73_v14 = vpop.permute.xlu0 %72  ;;  %v77_v15 = vpop.permute.xlu1 %76 }
  0x7f   :  { %v75_v16 = vpop.permute.xlu0 %74  ;;  %v79_v17 = vpop.permute.xlu1 %78 }
  0x80   :  { %v84_v18 = vsel %vm82_vm0, %v75_v16, %v77_v15  ;;  %v83_v19 = vsel %vm82_vm0, %v73_v14, %v75_v16  ;;  %v85_v22 = vsel %vm82_vm0, %v77_v15, %v79_v17  ;;  %v2232_v14 = vld [vmem:[%s2987_s1 + $0x20] sm:$0xff]  }
  0x81   :  { %2070 = vmatprep.subr.msk.bf16.mxu0 %vm91_vm1, %v84_v18  ;;  %v93_v20 = vsel %vm91_vm1, %v83_v19, 0  ;;  %v99_v28 = vsel %vm91_vm1, %v85_v22, 0 }
  0x82   :  { %122 = vmatpush1.bf16.msra.mxu0 %v93_v20 }
  0x83   :  { %v81_v23 = vpop.permute.xlu0 %80  ;;  %2159 = vmatprep.subr.bf16.mxu0 %v2253_v24  ;;  %v393_v25 = vpop.permute.xlu1 %392 }
  0x84   :  { %v105_v26 = vsel %vm91_vm1, %v81_v23, 0  ;;  %v86_v27 = vsel %vm82_vm0, %v79_v17, %v81_v23 }
  0x85   :  { %2071 = vmatmul.mubr.msk.bf16.vlgmr.msra.gmra.mxu0 %vm87_vm2, %v2228_v21  ;;  %2072 = vmatprep.subr.msk.bf16.mxu1 %vm91_vm1, %v86_v27  ;;  %v2233_v27 = vld [vmem:[%s2987_s1 + $0x28] sm:$0xff]  }
  0x86   :  { %165 = vmatpush1.bf16.msra.mxu1 %v99_v28  ;;  %2160 = vmatpush3.bf16.msra.mxu0 %v105_v26 }
  0x87   :  { %2076 = vmatprep.subr.msk.bf16.mxu1 %vm91_vm1, %v2315_v11  ;;  %2161 = vmatprep.mubr.msk.bf16.mxu0 %vm2254_vm3, %v2253_v24  ;;  %v395_v30 = vpop.permute.xlu0 %394  ;;  %v397_v31 = vpop.permute.xlu1 %396 }
  0x88   :  { %2078 = vmatprep.subr.msk.bf16.mxu0 %vm91_vm1, %v2319_v12  ;;  %v404_v35 = vsel %vm402_vm4, %v395_v30, %v397_v31  ;;  %v403_v40 = vsel %vm402_vm4, %v393_v25, %v395_v30 }
  0x89   :  { %2073 = vmatmul.mubr.msk.bf16.vlgmr.msra.gmra.mxu1 %vm87_vm2, %v2228_v21  ;;  %v411_v42 = vsel %vm91_vm1, %v403_v40, 0 }
  0x8a   :  { %272 = vmatpush1.bf16.msra.mxu1 %v243_v29  ;;  %289 = vmatprep.mubr.bf16.mxu1 %v2244_v7 }
  0x8b   :  { %2165 = vmatprep.subr.bf16.mxu1 %v2253_v24  ;;  %v399_v33 = vpop.permute.xlu0 %398  ;;  %v401_v34 = vpop.permute.xlu1 %400 }
  0x8c   :  { %v406_v41 = vsel %vm402_vm4, %v399_v33, %v401_v34  ;;  %v405_v45 = vsel %vm402_vm4, %v397_v31, %v399_v33  ;;  %v423_v51 = vsel %vm91_vm1, %v401_v34, 0 }
  0x8d   :  { %2162 = vmatmul.mubr.msk.bf16.vlgmr.msra.gmra.mxu0 %vm87_vm2, %v2228_v21  ;;  %v417_v46 = vsel %vm91_vm1, %v405_v45, 0 }
  0x8e   :  { %315 = vmatpush1.bf16.msra.mxu0 %v249_v32  ;;  %332 = vmatprep.mubr.bf16.mxu0 %v2244_v7 }
  0x8f   :  { %2084 = vmatprep.subr.msk.bf16.mxu0 %vm91_vm1, %v404_v35  ;;  %v571_v38 = vpop.permute.xlu0 %570  ;;  %v573_v39 = vpop.permute.xlu1 %572 }
  0x90   :  { %v581_v54 = vsel %vm580_vm5, %v571_v38, %v573_v39 }
  0x91   :  { %2077 = vmatmul.mubr.msk.bf16.vlgmr.msra.gmra.mxu1 %vm87_vm2, %v2229_v36  ;;  %v589_v56 = vsel %vm91_vm1, %v581_v54, 0 }
  0x92   :  { %2166 = vmatpush3.bf16.msra.mxu1 %v255_v37  ;;  %2167 = vmatprep.mubr.msk.bf16.mxu1 %vm2254_vm3, %v2253_v24 }
  0x93   :  { %2086 = vmatprep.subr.msk.bf16.mxu1 %vm91_vm1, %v406_v41  ;;  %v575_v43 = vpop.permute.xlu0 %574  ;;  %v577_v44 = vpop.permute.xlu1 %576 }
  0x94   :  { %v582_v49 = vsel %vm580_vm5, %v573_v39, %v575_v43  ;;  %v583_v59 = vsel %vm580_vm5, %v575_v43, %v577_v44  ;;  %v2234_v39 = vld [vmem:[%s2987_s1 + $0x30] sm:$0xff]  }
  0x95   :  { %2079 = vmatmul.mubr.msk.bf16.vlgmr.msra.gmra.mxu0 %vm87_vm2, %v2229_v36  ;;  %v595_v60 = vsel %vm91_vm1, %v583_v59, 0 }
  0x96   :  { %440 = vmatpush1.bf16.msra.mxu0 %v411_v42  ;;  %457 = vmatprep.mubr.bf16.mxu0 %v2244_v7 }
  0x97   :  { %2171 = vmatprep.subr.bf16.mxu0 %v2253_v24  ;;  %v579_v47 = vpop.permute.xlu0 %578  ;;  %v749_v48 = vpop.permute.xlu1 %748 }
  0x98   :  { %v584_v55 = vsel %vm580_vm5, %v577_v44, %v579_v47  ;;  %v601_v1 = vsel %vm91_vm1, %v579_v47, 0 }
  0x99   :  { %2168 = vmatmul.mubr.msk.bf16.vlgmr.msra.gmra.mxu1 %vm87_vm2, %v2229_v36 }
  0x9a   :  { %483 = vmatpush1.bf16.msra.mxu1 %v417_v46  ;;  %500 = vmatprep.mubr.bf16.mxu1 %v2244_v7 }
  0x9b   :  { %2092 = vmatprep.subr.msk.bf16.mxu1 %vm91_vm1, %v582_v49  ;;  %v751_v52 = vpop.permute.xlu0 %750  ;;  %v753_v53 = vpop.permute.xlu1 %752 }
  0x9c   :  { %v760_v63 = vsel %vm758_vm6, %v751_v52, %v753_v53  ;;  %v759_v5 = vsel %vm758_vm6, %v749_v48, %v751_v52 }
  0x9d   :  { %2085 = vmatmul.mubr.msk.bf16.vlgmr.msra.gmra.mxu0 %vm87_vm2, %v2230_v50  ;;  %v767_v8 = vsel %vm91_vm1, %v759_v5, 0 }
  0x9e   :  { %2172 = vmatpush3.bf16.msra.mxu0 %v423_v51  ;;  %2173 = vmatprep.mubr.msk.bf16.mxu0 %vm2254_vm3, %v2253_v24  ;;  %v2235_v51 = vld [vmem:[%s2987_s1 + $0x38] sm:$0xff]  }
  0x9f   :  { %2094 = vmatprep.subr.msk.bf16.mxu0 %vm91_vm1, %v584_v55  ;;  %v755_v57 = vpop.permute.xlu0 %754  ;;  %v757_v58 = vpop.permute.xlu1 %756 }
  0xa0   :  { %v762_v6 = vsel %vm758_vm6, %v755_v57, %v757_v58  ;;  %v761_v9 = vsel %vm758_vm6, %v753_v53, %v755_v57  ;;  %v779_v16 = vsel %vm91_vm1, %v757_v58, 0 }
  0xa1   :  { %2087 = vmatmul.mubr.msk.bf16.vlgmr.msra.gmra.mxu1 %vm87_vm2, %v2230_v50  ;;  %v773_v12 = vsel %vm91_vm1, %v761_v9, 0 }
  0xa2   :  { %618 = vmatpush1.bf16.msra.mxu1 %v589_v56  ;;  %635 = vmatprep.mubr.bf16.mxu1 %v2244_v7 }
  0xa3   :  { %2177 = vmatprep.subr.bf16.mxu1 %v2253_v24  ;;  %v927_v61 = vpop.permute.xlu0 %926  ;;  %v929_v62 = vpop.permute.xlu1 %928 }
  0xa4   :  { %v937_v18 = vsel %vm936_vm7, %v927_v61, %v929_v62 }
  0xa5   :  { %2174 = vmatmul.mubr.msk.bf16.vlgmr.msra.gmra.mxu0 %vm87_vm2, %v2230_v50  ;;  %v945_v20 = vsel %vm91_vm1, %v937_v18, 0 }
  0xa6   :  { %661 = vmatpush1.bf16.msra.mxu0 %v595_v60  ;;  %678 = vmatprep.mubr.bf16.mxu0 %v2244_v7  ;;  %v2236_v60 = vld [vmem:[%s2987_s1 + $0x40] sm:$0xff]  }
  0xa7   :  { %2100 = vmatprep.subr.msk.bf16.mxu0 %vm91_vm1, %v760_v63  ;;  %v931_v2 = vpop.permute.xlu0 %930  ;;  %v933_v3 = vpop.permute.xlu1 %932 }
  0xa8   :  { %v938_v13 = vsel %vm936_vm7, %v929_v62, %v931_v2  ;;  %v939_v22 = vsel %vm936_vm7, %v931_v2, %v933_v3 }
  0xa9   :  { %2093 = vmatmul.mubr.msk.bf16.vlgmr.msra.gmra.mxu1 %vm87_vm2, %v2231_v0  ;;  %v951_v25 = vsel %vm91_vm1, %v939_v22, 0 }
  0xaa   :  { %2178 = vmatpush3.bf16.msra.mxu1 %v601_v1  ;;  %2179 = vmatprep.mubr.msk.bf16.mxu1 %vm2254_vm3, %v2253_v24 }
  0xab   :  { %2102 = vmatprep.subr.msk.bf16.mxu1 %vm91_vm1, %v762_v6  ;;  %v935_v10 = vpop.permute.xlu0 %934  ;;  %v1105_v11 = vpop.permute.xlu1 %1104 }
  0xac   :  { %v940_v19 = vsel %vm936_vm7, %v933_v3, %v935_v10  ;;  %v957_v30 = vsel %vm91_vm1, %v935_v10, 0 }
  0xad   :  { %2095 = vmatmul.mubr.msk.bf16.vlgmr.msra.gmra.mxu0 %vm87_vm2, %v2231_v0 }
  0xae   :  { %796 = vmatpush1.bf16.msra.mxu0 %v767_v8  ;;  %813 = vmatprep.mubr.bf16.mxu0 %v2244_v7 }
  0xaf   :  { %2183 = vmatprep.subr.bf16.mxu0 %v2253_v24  ;;  %v1107_v15 = vpop.permute.xlu0 %1106  ;;  %v1109_v17 = vpop.permute.xlu1 %1108 }
  0xb0   :  { %v1116_v26 = vsel %vm1114_vm8, %v1107_v15, %v1109_v17  ;;  %v1115_v31 = vsel %vm1114_vm8, %v1105_v11, %v1107_v15 }
  0xb1   :  { %2180 = vmatmul.mubr.msk.bf16.vlgmr.msra.gmra.mxu1 %vm87_vm2, %v2231_v0  ;;  %v1123_v33 = vsel %vm91_vm1, %v1115_v31, 0 }
  0xb2   :  { %839 = vmatpush1.bf16.msra.mxu1 %v773_v12  ;;  %856 = vmatprep.mubr.bf16.mxu1 %v2244_v7 }
  0xb3   :  { %2108 = vmatprep.subr.msk.bf16.mxu1 %vm91_vm1, %v938_v13  ;;  %v1111_v21 = vpop.permute.xlu0 %1110  ;;  %v1113_v23 = vpop.permute.xlu1 %1112 }
  0xb4   :  { %v1118_v32 = vsel %vm1114_vm8, %v1111_v21, %v1113_v23  ;;  %v1117_v36 = vsel %vm1114_vm8, %v1109_v17, %v1111_v21  ;;  %v1135_v42 = vsel %vm91_vm1, %v1113_v23, 0 }
  0xb5   :  { %2101 = vmatmul.mubr.msk.bf16.vlgmr.msra.gmra.mxu0 %vm87_vm2, %v2232_v14  ;;  %v1129_v37 = vsel %vm91_vm1, %v1117_v36, 0 }
  0xb6   :  { %2184 = vmatpush3.bf16.msra.mxu0 %v779_v16  ;;  %2185 = vmatprep.mubr.msk.bf16.mxu0 %vm2254_vm3, %v2253_v24 }
  0xb7   :  { %2110 = vmatprep.subr.msk.bf16.mxu0 %vm91_vm1, %v940_v19  ;;  %v1283_v28 = vpop.permute.xlu0 %1282  ;;  %v1285_v29 = vpop.permute.xlu1 %1284 }
  0xb8   :  { %v1293_v43 = vsel %vm1292_vm9, %v1283_v28, %v1285_v29 }
  0xb9   :  { %2103 = vmatmul.mubr.msk.bf16.vlgmr.msra.gmra.mxu1 %vm87_vm2, %v2232_v14  ;;  %v1301_v45 = vsel %vm91_vm1, %v1293_v43, 0 }
  0xba   :  { %974 = vmatpush1.bf16.msra.mxu1 %v945_v20  ;;  %991 = vmatprep.mubr.bf16.mxu1 %v2244_v7 }
  0xbb   :  { %2189 = vmatprep.subr.bf16.mxu1 %v2253_v24  ;;  %v1287_v34 = vpop.permute.xlu0 %1286  ;;  %v1289_v35 = vpop.permute.xlu1 %1288 }
  0xbc   :  { %v1294_v38 = vsel %vm1292_vm9, %v1285_v29, %v1287_v34  ;;  %v1295_v48 = vsel %vm1292_vm9, %v1287_v34, %v1289_v35 }
  0xbd   :  { %2186 = vmatmul.mubr.msk.bf16.vlgmr.msra.gmra.mxu0 %vm87_vm2, %v2232_v14  ;;  %v1307_v49 = vsel %vm91_vm1, %v1295_v48, 0 }
  0xbe   :  { %1017 = vmatpush1.bf16.msra.mxu0 %v951_v25  ;;  %1034 = vmatprep.mubr.bf16.mxu0 %v2244_v7 }
  0xbf   :  { %2116 = vmatprep.subr.msk.bf16.mxu0 %vm91_vm1, %v1116_v26  ;;  %v1291_v40 = vpop.permute.xlu0 %1290  ;;  %v1461_v41 = vpop.permute.xlu1 %1460 }
  0xc0   :  { %v1296_v44 = vsel %vm1292_vm9, %v1289_v35, %v1291_v40  ;;  %v1313_v54 = vsel %vm91_vm1, %v1291_v40, 0 }
  0xc1   :  { %2109 = vmatmul.mubr.msk.bf16.vlgmr.msra.gmra.mxu1 %vm87_vm2, %v2233_v27 }
  0xc2   :  { %2190 = vmatpush3.bf16.msra.mxu1 %v957_v30  ;;  %2191 = vmatprep.mubr.msk.bf16.mxu1 %vm2254_vm3, %v2253_v24 }
  0xc3   :  { %2118 = vmatprep.subr.msk.bf16.mxu1 %vm91_vm1, %v1118_v32  ;;  %v1463_v46 = vpop.permute.xlu0 %1462  ;;  %v1465_v47 = vpop.permute.xlu1 %1464 }
  0xc4   :  { %v1472_v50 = vsel %vm1470_vm10, %v1463_v46, %v1465_v47  ;;  %v1471_v55 = vsel %vm1470_vm10, %v1461_v41, %v1463_v46 }
  0xc5   :  { %2111 = vmatmul.mubr.msk.bf16.vlgmr.msra.gmra.mxu0 %vm87_vm2, %v2233_v27  ;;  %v1479_v57 = vsel %vm91_vm1, %v1471_v55, 0 }
  0xc6   :  { %1152 = vmatpush1.bf16.msra.mxu0 %v1123_v33  ;;  %1169 = vmatprep.mubr.bf16.mxu0 %v2244_v7 }
  0xc7   :  { %2195 = vmatprep.subr.bf16.mxu0 %v2253_v24  ;;  %v1467_v52 = vpop.permute.xlu0 %1466  ;;  %v1469_v53 = vpop.permute.xlu1 %1468 }
  0xc8   :  { %v1474_v56 = vsel %vm1470_vm10, %v1467_v52, %v1469_v53  ;;  %v1473_v58 = vsel %vm1470_vm10, %v1465_v47, %v1467_v52  ;;  %v1491_v61 = vsel %vm91_vm1, %v1469_v53, 0 }
  0xc9   :  { %2192 = vmatmul.mubr.msk.bf16.vlgmr.msra.gmra.mxu1 %vm87_vm2, %v2233_v27  ;;  %v1485_v59 = vsel %vm91_vm1, %v1473_v58, 0 }
  0xca   :  { %1195 = vmatpush1.bf16.msra.mxu1 %v1129_v37  ;;  %1212 = vmatprep.mubr.bf16.mxu1 %v2244_v7 }
  0xcb   :  { %2124 = vmatprep.subr.msk.bf16.mxu1 %vm91_vm1, %v1294_v38 }
  0xcd   :  { %2117 = vmatmul.mubr.msk.bf16.vlgmr.msra.gmra.mxu0 %vm87_vm2, %v2234_v39 }
  0xce   :  { %2196 = vmatpush3.bf16.msra.mxu0 %v1135_v42  ;;  %2197 = vmatprep.mubr.msk.bf16.mxu0 %vm2254_vm3, %v2253_v24 }
  0xcf   :  { %2126 = vmatprep.subr.msk.bf16.mxu0 %vm91_vm1, %v1296_v44 }
  0xd1   :  { %2119 = vmatmul.mubr.msk.bf16.vlgmr.msra.gmra.mxu1 %vm87_vm2, %v2234_v39 }
  0xd2   :  { %1330 = vmatpush1.bf16.msra.mxu1 %v1301_v45  ;;  %1347 = vmatprep.mubr.bf16.mxu1 %v2244_v7 }
  0xd3   :  { %2201 = vmatprep.subr.bf16.mxu1 %v2253_v24 }
  0xd5   :  { %2198 = vmatmul.mubr.msk.bf16.vlgmr.msra.gmra.mxu0 %vm87_vm2, %v2234_v39 }
  0xd6   :  { %1373 = vmatpush1.bf16.msra.mxu0 %v1307_v49  ;;  %1390 = vmatprep.mubr.bf16.mxu0 %v2244_v7 }
  0xd7   :  { %2132 = vmatprep.subr.msk.bf16.mxu0 %vm91_vm1, %v1472_v50 }
  0xd9   :  { %2125 = vmatmul.mubr.msk.bf16.vlgmr.msra.gmra.mxu1 %vm87_vm2, %v2235_v51 }
  0xda   :  { %2202 = vmatpush3.bf16.msra.mxu1 %v1313_v54  ;;  %2203 = vmatprep.mubr.msk.bf16.mxu1 %vm2254_vm3, %v2253_v24 }
  0xdb   :  { %2134 = vmatprep.subr.msk.bf16.mxu1 %vm91_vm1, %v1474_v56 }
  0xdd   :  { %2127 = vmatmul.mubr.msk.bf16.vlgmr.msra.gmra.mxu0 %vm87_vm2, %v2235_v51 }
  0xde   :  { %1508 = vmatpush1.bf16.msra.mxu0 %v1479_v57  ;;  %1525 = vmatprep.mubr.bf16.mxu0 %v2244_v7 }
  0xdf   :  { %2207 = vmatprep.subr.bf16.mxu0 %v2253_v24 }
  0xe1   :  { %2204 = vmatmul.mubr.msk.bf16.vlgmr.msra.gmra.mxu1 %vm87_vm2, %v2235_v51 }
  0xe2   :  { %1551 = vmatpush1.bf16.msra.mxu1 %v1485_v59  ;;  %1568 = vmatprep.mubr.bf16.mxu1 %v2244_v7 }
  0xe5   :  { %2133 = vmatmul.mubr.msk.bf16.vlgmr.msra.gmra.mxu0 %vm87_vm2, %v2236_v60 }
  0xe6   :  { %2208 = vmatpush3.bf16.msra.mxu0 %v1491_v61  ;;  %2209 = vmatprep.mubr.msk.bf16.mxu0 %vm2254_vm3, %v2253_v24 }
  0xe9   :  { %2135 = vmatmul.mubr.msk.bf16.vlgmr.msra.gmra.mxu1 %vm87_vm2, %v2236_v60 }
  0xed   :  { %2210 = vmatmul.mubr.msk.bf16.vlgmr.msra.gmra.mxu0 %vm87_vm2, %v2236_v60 }
 0x145   :  { %v141_v62 = vpop.f32.mrf.mxu0 }
 0x147   :  { %v143_v63 = vpop.f32.mrf.mxu0 }
 0x149   :  { %v145_v0 = vpop.f32.mrf.mxu0  ;;  %v184_v1 = vpop.f32.mrf.mxu1 }
 0x14b   :  { %v147_v2 = vpop.f32.mrf.mxu0  ;;  %v186_v3 = vpop.f32.mrf.mxu1 }
 0x14d   :  { %v188_v5 = vpop.f32.mrf.mxu1  ;;  %v227_v7 = vpop.f32.mrf.mxu0 }
 0x14f   :  { %v190_v6 = vpop.f32.mrf.mxu1  ;;  %v2163_v8 = vpop.f32.mrf.mxu0 }
 0x151   :  { %v230_v9 = vpop.f32.mrf.mxu0  ;;  %v291_v10 = vpop.f32.mrf.mxu1 }
 0x152   :  { %v292_v11 = vadd.f32 %v291_v10, %v141_v62 }
 0x153   :  { %v2164_v12 = vpop.f32.mrf.mxu0  ;;  %v293_v13 = vpop.f32.mrf.mxu1 }
 0x154   :  { %v2581_v24 = vadd.f32 %v293_v13, %v143_v63 }
 0x155   :  { %v295_v14 = vpop.f32.mrf.mxu1  ;;  %v334_v15 = vpop.f32.mrf.mxu0 }
 0x156   :  { %v2583_v16 = vadd.f32 %v295_v14, %v145_v0  ;;  %v2585_v17 = vadd.f32 %v334_v15, %v184_v1 }
 0x157   :  { %v297_v18 = vpop.f32.mrf.mxu1  ;;  %v336_v19 = vpop.f32.mrf.mxu0 }
 0x158   :  { %v2587_v20 = vadd.f32 %v297_v18, %v147_v2  ;;  %v2589_v21 = vadd.f32 %v336_v19, %v186_v3 }
 0x159   :  { %v338_v22 = vpop.f32.mrf.mxu0  ;;  %v377_v23 = vpop.f32.mrf.mxu1 }
 0x15a   :  { %v2591_v25 = vadd.f32 %v338_v22, %v188_v5  ;;  %v2593_v26 = vadd.f32 %v377_v23, %v227_v7 }
 0x15b   :  { %v340_v27 = vpop.f32.mrf.mxu0  ;;  %v2169_v28 = vpop.f32.mrf.mxu1 }
 0x15c   :  { %v2595_v29 = vadd.f32 %v340_v27, %v190_v6 }
 0x15d   :  { %v380_v30 = vpop.f32.mrf.mxu1  ;;  %v459_v31 = vpop.f32.mrf.mxu0 }
 0x15e   :  { %v2597_v32 = vadd.f32 %v380_v30, %v230_v9  ;;  %v2599_v33 = vadd.f32 %v459_v31, %v292_v11 }
 0x15f   :  { %v2170_v34 = vpop.f32.mrf.mxu1  ;;  %v2601_v35 = vpop.f32.mrf.mxu0 }
 0x161   :  { %v2603_v36 = vpop.f32.mrf.mxu0  ;;  %v2605_v37 = vpop.f32.mrf.mxu1 }
 0x163   :  { %v2607_v38 = vpop.f32.mrf.mxu0  ;;  %v2609_v39 = vpop.f32.mrf.mxu1 }
 0x165   :  { %v2611_v40 = vpop.f32.mrf.mxu1  ;;  %v2613_v41 = vpop.f32.mrf.mxu0 }
 0x167   :  { %v2615_v42 = vpop.f32.mrf.mxu1  ;;  %v2175_v43 = vpop.f32.mrf.mxu0 }
 0x169   :  { %v2617_v44 = vpop.f32.mrf.mxu0  ;;  %v2619_v45 = vpop.f32.mrf.mxu1 }
 0x16b   :  { %v2176_v46 = vpop.f32.mrf.mxu0  ;;  %v2621_v47 = vpop.f32.mrf.mxu1 }
 0x16d   :  { %v2623_v48 = vpop.f32.mrf.mxu1  ;;  %v2625_v49 = vpop.f32.mrf.mxu0 }
 0x16f   :  { %v2627_v50 = vpop.f32.mrf.mxu1  ;;  %v2629_v51 = vpop.f32.mrf.mxu0 }
 0x171   :  { %v2631_v52 = vpop.f32.mrf.mxu0  ;;  %v2633_v53 = vpop.f32.mrf.mxu1 }
 0x173   :  { %v2635_v54 = vpop.f32.mrf.mxu0  ;;  %v2181_v55 = vpop.f32.mrf.mxu1 }
 0x175   :  { %v2637_v56 = vpop.f32.mrf.mxu1  ;;  %v2639_v57 = vpop.f32.mrf.mxu0 }
 0x177   :  { %v2182_v58 = vpop.f32.mrf.mxu1  ;;  %v2641_v59 = vpop.f32.mrf.mxu0 }
 0x179   :  { %v2643_v60 = vpop.f32.mrf.mxu0  ;;  %v2645_v61 = vpop.f32.mrf.mxu1 }
 0x17b   :  { %v2647_v62 = vpop.f32.mrf.mxu0  ;;  %v2649_v63 = vpop.f32.mrf.mxu1 }
 0x17d   :  { %v2651_v0 = vpop.f32.mrf.mxu1  ;;  %v2653_v1 = vpop.f32.mrf.mxu0 }
 0x17f   :  { %v2655_v2 = vpop.f32.mrf.mxu1  ;;  %v2187_v3 = vpop.f32.mrf.mxu0 }
 0x180   :  { %v1633_v3 = vsub.s32 0, %v2298_v4 }
 0x181   :  { %v2657_v5 = vpop.f32.mrf.mxu0  ;;  %v993_v7 = vpop.f32.mrf.mxu1 }
 0x183   :  { %v2188_v6 = vpop.f32.mrf.mxu0  ;;  %v2659_v8 = vpop.f32.mrf.mxu1 }
 0x184   :  { %v1637_v6 = vsub.s32 1, %v2298_v4 }
 0x185   :  { %v2661_v9 = vpop.f32.mrf.mxu1  ;;  %v2663_v10 = vpop.f32.mrf.mxu0 }
 0x187   :  { %v2665_v11 = vpop.f32.mrf.mxu1  ;;  %v2667_v12 = vpop.f32.mrf.mxu0 }
 0x189   :  { %v2669_v13 = vpop.f32.mrf.mxu0  ;;  %v2671_v14 = vpop.f32.mrf.mxu1 }
 0x18a   :  { %2994 = vst [vmem:[#allocation2_spill] sm:$0xff] %v2669_v13  ;;  %2995 = vst [vmem:[#allocation3_spill] sm:$0xff] %v2671_v14  ;;  %v557_v13 = vadd.f32 %v2603_v36, %v2583_v16  ;;  %v556_v16 = vadd.f32 %v2613_v41, %v2593_v26 }
 0x18b   :  { %v2673_v15 = vpop.f32.mrf.mxu0  ;;  %v2193_v18 = vpop.f32.mrf.mxu1 }
 0x18c   :  { %2996 = vst [vmem:[#allocation4_spill] sm:$0xff] %v2673_v15  ;;  %v1641_v18 = vsub.s32 2, %v2298_v4 }
 0x18d   :  { %v2675_v19 = vpop.f32.mrf.mxu1  ;;  %v1171_v22 = vpop.f32.mrf.mxu0 }
 0x18e   :  { %2997 = vst [vmem:[#allocation5_spill] sm:$0xff] %v2675_v19 }
 0x18f   :  { %v2194_v23 = vpop.f32.mrf.mxu1  ;;  %v2677_v27 = vpop.f32.mrf.mxu0 }
 0x190   :  { %v1645_v23 = vsub.s32 3, %v2298_v4 }
 0x191   :  { %v2679_v28 = vpop.f32.mrf.mxu0  ;;  %v2681_v30 = vpop.f32.mrf.mxu1 }
 0x192   :  { %2998 = vst [vmem:[#allocation6_spill] sm:$0xff] %v2679_v28  ;;  %2999 = vst [vmem:[#allocation7_spill] sm:$0xff] %v2681_v30  ;;  %v553_v28 = vadd.f32 %v2601_v35, %v2581_v24  ;;  %v559_v24 = vadd.f32 %v2611_v40, %v2591_v25 }
 0x193   :  { %v2683_v31 = vpop.f32.mrf.mxu0  ;;  %v2685_v34 = vpop.f32.mrf.mxu1 }
 0x194   :  { %3000 = vst [vmem:[#allocation8_spill] sm:$0xff] %v2683_v31  ;;  %3001 = vst [vmem:[#allocation9_spill] sm:$0xff] %v2685_v34  ;;  %v35_v31 = vld [vmem:[%s2988_s6] sm:$0x1f]  ;;  %v1649_v34 = vsub.s32 4, %v2298_v4  ;;  %v730_v4 = vadd.f32 %v2619_v45, %v2599_v33  ;;  %v560_v33 = vadd.f32 %v2615_v42, %v2595_v29  ;;  %v731_v36 = vadd.f32 %v2621_v47, %v553_v28 }
 0x195   :  { %v2687_v43 = vpop.f32.mrf.mxu1  ;;  %v2689_v46 = vpop.f32.mrf.mxu0  ;;  %v2705_v15 = vrot.slane %v35_v31, %v1637_v6  ;;  %v2707_v14 = vrot.slane %v35_v31, %v1641_v18  ;;  %v2709_v30 = vrot.slane %v35_v31, %v1645_v23  ;;  %v555_v6 = vadd.f32 %v2609_v39, %v2589_v21 }
 0x196   :  { %3002 = vst [vmem:[#allocation10_spill] sm:$0xff] %v2687_v43  ;;  %3003 = vst [vmem:[#allocation11_spill] sm:$0xff] %v2689_v46  ;;  %v735_v21 = vadd.f32 %v2623_v48, %v557_v13  ;;  %v737_v40 = vadd.f32 %v2631_v52, %v559_v24  ;;  %v909_v29 = vadd.f32 %v2641_v59, %v731_v36 }
 0x197   :  { %v2691_v55 = vpop.f32.mrf.mxu1  ;;  %v2199_v58 = vpop.f32.mrf.mxu0  ;;  %v733_v26 = vadd.f32 %v2629_v51, %v555_v6  ;;  %v734_v42 = vadd.f32 %v2633_v53, %v556_v16  ;;  %v738_v45 = vadd.f32 %v2635_v54, %v560_v33 }
 0x198   :  { %3004 = vst [vmem:[#allocation12_spill] sm:$0xff] %v2691_v55  ;;  %v2703_v58 = vrot.slane %v35_v31, %v1633_v3  ;;  %v558_v3 = vadd.f32 %v2607_v38, %v2587_v20  ;;  %v561_v20 = vadd.f32 %v2617_v44, %v2597_v32  ;;  %v913_v44 = vadd.f32 %v2643_v60, %v735_v21 }
 0x199   :  { %v2701_v43 = vpop.f32.mrf.mxu0  ;;  %v1349_v46 = vpop.f32.mrf.mxu1  ;;  %v1087_v51 = vadd.f32 %v2659_v8, %v909_v29  ;;  %v915_v59 = vadd.f32 %v2651_v0, %v737_v40  ;;  %v912_v53 = vadd.f32 %v2653_v1, %v734_v42  ;;  %v916_v54 = vadd.f32 %v2655_v2, %v738_v45  ;;  %v3006_v0 = vld [vmem:[#allocation2_spill] sm:$0xff]  ;;  %v3008_v23 = vld [vmem:[#allocation7_spill] sm:$0xff] }
 0x19a   :  { %3005 = vst [vmem:[#allocation13_spill] sm:$0xff] %v2701_v43  ;;  %v2717_v43 = vrot.slane %v35_v31, %v1649_v34  ;;  %v736_v25 = vadd.f32 %v2627_v50, %v558_v3  ;;  %v739_v32 = vadd.f32 %v2637_v56, %v561_v20  ;;  %v1091_v60 = vadd.f32 %v2661_v9, %v913_v44  ;;  %v3007_v2 = vld [vmem:[#allocation6_spill] sm:$0xff] }
 0x19b   :  { %v2200_v19 = vpop.f32.mrf.mxu0  ;;  %v1351_v55 = vpop.f32.mrf.mxu1  ;;  %v1093_v28 = vadd.f32 %v3006_v0, %v915_v59 }
 0x19c   :  { %v554_v19 = vadd.f32 %v2605_v37, %v2585_v17  ;;  %v908_v17 = vadd.f32 %v2639_v57, %v730_v4  ;;  %v914_v50 = vadd.f32 %v2647_v62, %v736_v25  ;;  %v911_v57 = vadd.f32 %v2649_v63, %v733_v26 }
 0x19d   :  { %v1353_v35 = vpop.f32.mrf.mxu1  ;;  %v1392_v18 = vpop.f32.mrf.mxu0  ;;  %v917_v8 = vadd.f32 %v2657_v5, %v739_v32  ;;  %v1269_v34 = vadd.f32 %v3007_v2, %v1091_v60  ;;  %v3011_v5 = vld [vmem:[#allocation5_spill] sm:$0xff]  ;;  %v3015_v26 = vld [vmem:[#allocation11_spill] sm:$0xff] }
 0x19e   :  { %v732_v37 = vadd.f32 %v2625_v49, %v554_v19  ;;  %v1086_v41 = vadd.f32 %v993_v7, %v908_v17  ;;  %v1089_v63 = vadd.f32 %v2667_v12, %v911_v57 }
 0x19f   :  { %v1355_v38 = vpop.f32.mrf.mxu1  ;;  %v1394_v39 = vpop.f32.mrf.mxu0  ;;  %v1095_v6 = vadd.f32 %v3011_v5, %v917_v8  ;;  %v1447_v33 = vadd.f32 %v1353_v35, %v1269_v34  ;;  %v3016_v29 = vld [vmem:[#allocation12_spill] sm:$0xff] }
 0x1a0   :  { %v910_v49 = vadd.f32 %v2645_v61, %v732_v37  ;;  %v1264_v52 = vadd.f32 %v1171_v22, %v1086_v41  ;;  %v1265_v61 = vadd.f32 %v2677_v27, %v1087_v51  ;;  %v1092_v22 = vadd.f32 %v2665_v11, %v914_v50  ;;  %v3012_v11 = vld [vmem:[#allocation8_spill] sm:$0xff]  ;;  %v3014_v37 = vld [vmem:[#allocation10_spill] sm:$0xff] }
 0x1a1   :  { %v1396_v47 = vpop.f32.mrf.mxu0  ;;  %v1435_v48 = vpop.f32.mrf.mxu1  ;;  %v1271_v25 = vadd.f32 %v3014_v37, %v1093_v28  ;;  %v3017_v32 = vld [vmem:[#allocation13_spill] sm:$0xff] }
 0x1a2   :  { %v1088_v13 = vadd.f32 %v2663_v10, %v910_v49  ;;  %v1442_v62 = vadd.f32 %v1349_v46, %v1264_v52  ;;  %v1443_v9 = vadd.f32 %v1351_v55, %v1265_v61  ;;  %v3009_v10 = vld [vmem:[#allocation3_spill] sm:$0xff]  ;;  %v3010_v46 = vld [vmem:[#allocation4_spill] sm:$0xff]  ;;  %v1270_v24 = vadd.f32 %v3012_v11, %v1092_v22  ;;  %v3013_v55 = vld [vmem:[#allocation9_spill] sm:$0xff] }
 0x1a3   :  { %v1398_v56 = vpop.f32.mrf.mxu0  ;;  %v2205_v7 = vpop.f32.mrf.mxu1  ;;  %v1090_v27 = vadd.f32 %v3009_v10, %v912_v53  ;;  %v1094_v3 = vadd.f32 %v3010_v46, %v916_v54  ;;  %v1267_v21 = vadd.f32 %v3013_v55, %v1089_v63  ;;  %v1273_v44 = vadd.f32 %v3017_v32, %v1095_v6 }
 0x1a4   :  { %v1266_v4 = vadd.f32 %v3008_v23, %v1088_v13  ;;  %v1448_v50 = vadd.f32 %v1355_v38, %v1270_v24  ;;  %v1449_v52 = vadd.f32 %v1396_v47, %v1271_v25 }
 0x1a5   :  { %v1438_v1 = vpop.f32.mrf.mxu1  ;;  %v1527_v31 = vpop.f32.mrf.mxu0  ;;  %v1268_v40 = vadd.f32 %v3015_v26, %v1090_v27  ;;  %v1272_v41 = vadd.f32 %v3016_v29, %v1094_v3  ;;  %v1445_v51 = vadd.f32 %v1394_v39, %v1267_v21 }
 0x1a6   :  { %v2761_v19 = vadd.f32 %v1527_v31, %v1442_v62  ;;  %v1444_v36 = vadd.f32 %v1392_v18, %v1266_v4  ;;  %v1451_v22 = vadd.f32 %v1438_v1, %v1273_v44 }
 0x1a7   :  { %v2206_v12 = vpop.f32.mrf.mxu1  ;;  %v1529_v16 = vpop.f32.mrf.mxu0  ;;  %v1446_v61 = vadd.f32 %v1435_v48, %v1268_v40  ;;  %v1450_v62 = vadd.f32 %v1398_v56, %v1272_v41 }
 0x1a8   :  { %v1656_v17 = vmul.f32 %v2703_v58, %v2761_v19  ;;  %v2769_v20 = vadd.f32 %v1529_v16, %v1443_v9 }
 0x1a9   :  { %v1531_v42 = vpop.f32.mrf.mxu0  ;;  %v1570_v45 = vpop.f32.mrf.mxu1 }
 0x1aa   :  { %v1657_v35 = vmul.f32 %v2705_v15, %v2769_v20  ;;  %v2778_v18 = vadd.f32 %v1531_v42, %v1447_v33  ;;  %v2780_v49 = vadd.f32 %v1570_v45, %v1444_v36  ;;  %v1683_v57 = vmul.f32 %v1656_v17, %v2761_v19 }
 0x1ab   :  { %v1533_v59 = vpop.f32.mrf.mxu0  ;;  %v1572_v53 = vpop.f32.mrf.mxu1 }
 0x1ac   :  { %v1666_v54 = vadd.f32 %v1657_v35, %v1656_v17  ;;  %v1684_v7 = vmul.f32 %v1657_v35, %v2769_v20  ;;  %v1661_v60 = vmul.f32 %v2703_v58, %v2778_v18  ;;  %v1658_v13 = vmul.f32 %v2707_v14, %v2780_v49 }
 0x1ad   :  { %v2788_v8 = vadd.f32 %v1533_v59, %v1448_v50  ;;  %v2790_v38 = vadd.f32 %v1572_v53, %v1445_v51  ;;  %v1574_v39 = vpop.f32.mrf.mxu1  ;;  %v1613_v47 = vpop.f32.mrf.mxu0 }
 0x1ae   :  { %v1693_v63 = vadd.f32 %v1684_v7, %v1683_v57  ;;  %v1685_v0 = vmul.f32 %v1658_v13, %v2780_v49  ;;  %v2793_v28 = vadd.f32 %v1574_v39, %v1449_v52  ;;  %v2799_v48 = vadd.f32 %v1613_v47, %v1446_v61 }
 0x1af   :  { %v1662_v58 = vmul.f32 %v2705_v15, %v2788_v8  ;;  %v1659_v31 = vmul.f32 %v2709_v30, %v2790_v38  ;;  %v1576_v56 = vpop.f32.mrf.mxu1  ;;  %v2211_v2 = vpop.f32.mrf.mxu0  ;;  %v1667_v34 = vadd.f32 %v1666_v54, %v1658_v13  ;;  %v1688_v23 = vmul.f32 %v1661_v60, %v2778_v18 }
 0x1b0   :  { %v1663_v1 = vmul.f32 %v2707_v14, %v2793_v28  ;;  %v2804_v4 = vadd.f32 %v1576_v56, %v1450_v62  ;;  %v1694_v9 = vadd.f32 %v1693_v63, %v1685_v0  ;;  %v1660_v3 = vmul.f32 %v2717_v43, %v2799_v48 }
 0x1b1   :  { %v1674_v10 = vadd.f32 %v1662_v58, %v1661_v60  ;;  %v1689_v27 = vmul.f32 %v1662_v58, %v2788_v8  ;;  %v1686_v15 = vmul.f32 %v1659_v31, %v2790_v38  ;;  %v1616_v46 = vpop.f32.mrf.mxu0  ;;  %v1668_v14 = vadd.f32 %v1667_v34, %v1659_v31  ;;  %v32_v58 = vld [vmem:[%s2990_s3] sm:$0xff]  ;;  %v31_v31 = vld [vmem:[%s2989_s2 + $0x8] sm:$0xff] }
 0x1b2   :  { %v1690_v5 = vmul.f32 %v1663_v1, %v2793_v28  ;;  %v1664_v6 = vmul.f32 %v2709_v30, %v2804_v4  ;;  %v2813_v11 = vadd.f32 %v1616_v46, %v1451_v22  ;;  %v1670_v16 = vsel %vm1669_vm11, %v1660_v3, 0.0  ;;  %v30_v22 = vld [vmem:[%s2989_s2] sm:$0xff] }
 0x1b3   :  { %v1700_v24 = vadd.f32 %v1689_v27, %v1688_v23  ;;  %v2212_v12 = vpop.f32.mrf.mxu0  ;;  %v1675_v33 = vadd.f32 %v1674_v10, %v1663_v1  ;;  %v1687_v36 = vmul.f32 %v1660_v3, %v2799_v48  ;;  %v1671_v55 = vadd.f32 %v1670_v16, %v1668_v14  ;;  %v33_v1 = vld [vmem:[%s2990_s3 + $0x8] sm:$0xff] }
 0x1b4   :  { %v1691_v17 = vmul.f32 %v1664_v6, %v2804_v4  ;;  %v1665_v21 = vmul.f32 %v2717_v43, %v2813_v11  ;;  %v1695_v37 = vadd.f32 %v1694_v9, %v1686_v15 }
 0x1b5   :  { %v1676_v25 = vadd.f32 %v1675_v33, %v1664_v6  ;;  %v1696_v30 = vsel %vm1669_vm11, %v1687_v36, 0.0  ;;  %v1701_v26 = vadd.f32 %v1700_v24, %v1690_v5  ;;  %1672 = vadd.xlane.f32.xlu0 %v1671_v55 }
 0x1b6   :  { %v1677_v40 = vsel %vm1669_vm11, %v1665_v21, 0.0  ;;  %v1692_v29 = vmul.f32 %v1665_v21, %v2813_v11  ;;  %v1697_v42 = vadd.f32 %v1696_v30, %v1695_v37 }
 0x1b7   :  { %v1678_v41 = vadd.f32 %v1677_v40, %v1676_v25  ;;  %v1702_v45 = vadd.f32 %v1701_v26, %v1691_v17 }
 0x1b8   :  { %v1703_v32 = vsel %vm1669_vm11, %v1692_v29, 0.0 }
 0x1b9   :  { %1679 = vadd.xlane.f32.xlu1 %v1678_v41  ;;  %1698 = vadd.xlane.f32.xlu0 %v1697_v42  ;;  %v1704_v44 = vadd.f32 %v1703_v32, %v1702_v45 }
 0x1bd   :  { %1705 = vadd.xlane.f32.xlu0 %v1704_v44 }
 0x23e   :  { %v1673_v43 = vpop.xlane.xlu0 %1672 }
 0x23f   :  { %v1681_v35 = vmul.f32 0.0025510204, %v1673_v43 }
 0x241   :  { %v1709_v52 = vmul.f32 %v1681_v35, %v1681_v35 }
 0x242   :  { %v1680_v50 = vpop.xlane.xlu1 %1679  ;;  %v1699_v51 = vpop.xlane.xlu0 %1698 }
 0x243   :  { %v1682_v57 = vmul.f32 0.0025510204, %v1680_v50  ;;  %v1707_v59 = vmul.f32 0.0025510204, %v1699_v51 }
 0x245   :  { %v1711_v53 = vsub.f32 %v1707_v59, %v1709_v52  ;;  %v1710_v7 = vmul.f32 %v1682_v57, %v1682_v57 }
 0x246   :  { %v1706_v54 = vpop.xlane.xlu0 %1705 }
 0x247   :  { %v1713_v60 = vmax.f32 %v1711_v53, 0.0  ;;  %v1708_v13 = vmul.f32 0.0025510204, %v1706_v54 }
 0x249   :  { %v1715_v61 = vadd.f32 1e-05, %v1713_v60  ;;  %v1712_v62 = vsub.f32 %v1708_v13, %v1710_v7 }
 0x24b   :  { %2239 = vrsqrt.f32 %v1715_v61  ;;  %v1714_v39 = vmax.f32 %v1712_v62, 0.0  ;;  %v34_v62 = vld [vmem:[%s2991_s5] sm:$0xff] }
 0x24d   :  { %v1716_v47 = vadd.f32 1e-05, %v1714_v39  ;;  %v2925_v39 = vld [vmem:[%s2992_s4] sm:$0xff] }
 0x24f   :  { %2241 = vrsqrt.f32 %v1716_v47  ;;  %v2138_v47 = vcombine.high %v2925_v39, %v2925_v39 }
 0x258   :  { %v2240_v63 = vpop.eup %2239 }
 0x259   :  { %v1719_v0 = vmul.f32 %v2240_v63, %v30_v22 }
 0x25b   :  { %1727 = vperm.xlu1 %2225, %v1719_v0   ;;  %v1721_v56 = vmul.f32 %v1719_v0, %v1681_v35 }
 0x25c   :  { %v2242_v2 = vpop.eup %2241 }
 0x25d   :  { %v1723_v34 = vsub.f32 %v32_v58, %v1721_v56  ;;  %v1720_v23 = vmul.f32 %v2242_v2, %v31_v31 }
 0x25f   :  { %1747 = vperm.xlu1 %2225, %v1723_v34   ;;  %1732 = vperm.xlu0 %2226, %v1720_v23   ;;  %v1722_v9 = vmul.f32 %v1720_v23, %v1682_v57 }
 0x261   :  { %v1724_v10 = vsub.f32 %v33_v1, %v1722_v9 }
 0x263   :  { %1752 = vperm.xlu1 %2225, %v1724_v10  }
 0x2d6   :  { %v1728_v27 = vpop.permute.xlu1 %1727 }
 0x2d7   :  { %v1736_v46 = vmul.f32 %v1728_v27, %v2769_v20  ;;  %v1737_v5 = vmul.f32 %v1728_v27, %v2780_v49  ;;  %v1739_v16 = vmul.f32 %v1728_v27, %v2799_v48  ;;  %v1738_v36 = vmul.f32 %v1728_v27, %v2790_v38 }
 0x2d8   :  { %v1735_v51 = vmul.f32 %v1728_v27, %v2761_v19 }
 0x2da   :  { %v1748_v15 = vpop.permute.xlu1 %1747  ;;  %v1733_v3 = vpop.permute.xlu0 %1732 }
 0x2db   :  { %v1756_v6 = vadd.f32 %v1748_v15, %v1736_v46  ;;  %v1757_v14 = vadd.f32 %v1748_v15, %v1737_v5  ;;  %v1741_v24 = vmul.f32 %v1733_v3, %v2788_v8  ;;  %v1742_v33 = vmul.f32 %v1733_v3, %v2793_v28 }
 0x2dc   :  { %v1744_v17 = vmul.f32 %v1733_v3, %v2813_v11  ;;  %v1759_v21 = vadd.f32 %v1748_v15, %v1739_v16  ;;  %v1743_v20 = vmul.f32 %v1733_v3, %v2804_v4  ;;  %v1758_v26 = vadd.f32 %v1748_v15, %v1738_v36 }
 0x2dd   :  { %v1776_v37 = vmul.f32 0.01, %v1756_v6  ;;  %vm1766_vm12 = vcmp.ge.f32.partialorder %v1756_v6, 0.0  ;;  %v1777_v49 = vmul.f32 0.01, %v1757_v14  ;;  %vm1767_vm14 = vcmp.ge.f32.partialorder %v1757_v14, 0.0 }
 0x2de   :  { %v1753_v12 = vpop.permute.xlu1 %1752  ;;  %v1779_v29 = vmul.f32 0.01, %v1759_v21  ;;  %vm1769_vm2 = vcmp.ge.f32.partialorder %v1759_v21, 0.0  ;;  %v1778_v43 = vmul.f32 0.01, %v1758_v26  ;;  %v1740_v35 = vmul.f32 %v1733_v3, %v2778_v18 }
 0x2df   :  { %v1761_v55 = vadd.f32 %v1753_v12, %v1741_v24  ;;  %v1762_v25 = vadd.f32 %v1753_v12, %v1742_v33  ;;  %v1764_v30 = vadd.f32 %v1753_v12, %v1744_v17  ;;  %v1763_v8 = vadd.f32 %v1753_v12, %v1743_v20 }
 0x2e0   :  { %v1786_v40 = vsel %vm1766_vm12, %v1756_v6, %v1776_v37  ;;  %v1787_v41 = vsel %vm1767_vm14, %v1757_v14, %v1777_v49  ;;  %vm1768_vm11 = vcmp.ge.f32.partialorder %v1758_v26, 0.0  ;;  %v1789_v50 = vsel %vm1769_vm2, %v1759_v21, %v1779_v29 }
 0x2e1   :  { %vm1771_vm13 = vcmp.ge.f32.partialorder %v1761_v55, 0.0  ;;  %vm1772_vm15 = vcmp.ge.f32.partialorder %v1762_v25, 0.0  ;;  %v1781_v48 = vmul.f32 0.01, %v1761_v55  ;;  %v1782_v28 = vmul.f32 0.01, %v1762_v25 }
 0x2e2   :  { %vm1774_vm1 = vcmp.ge.f32.partialorder %v1764_v30, 0.0  ;;  %v1784_v38 = vmul.f32 0.01, %v1764_v30  ;;  %v1783_v4 = vmul.f32 0.01, %v1763_v8  ;;  %vm1773_vm3 = vcmp.ge.f32.partialorder %v1763_v8, 0.0 }
 0x2e3   :  { %v1791_v11 = vsel %vm1771_vm13, %v1761_v55, %v1781_v48  ;;  %v1792_v42 = vsel %vm1772_vm15, %v1762_v25, %v1782_v28  ;;  %v1760_v52 = vadd.f32 %v1753_v12, %v1740_v35  ;;  %v1755_v53 = vadd.f32 %v1748_v15, %v1735_v51 }
 0x2e4   :  { %v2844_v45 = vpack.c.bf16 %v1791_v11, %v1786_v40  ;;  %v2846_v32 = vpack.c.bf16 %v1792_v42, %v1787_v41  ;;  %v1794_v44 = vsel %vm1774_vm1, %v1764_v30, %v1784_v38  ;;  %v1793_v57 = vsel %vm1773_vm3, %v1763_v8, %v1783_v4 }
 0x2e5   :  { %v1799_v59 = vpack.c.bf16 %v1794_v44, %v1789_v50  ;;  %v1788_v54 = vsel %vm1768_vm11, %v1758_v26, %v1778_v43  ;;  %v1780_v18 = vmul.f32 0.01, %v1760_v52  ;;  %vm1770_vm12 = vcmp.ge.f32.partialorder %v1760_v52, 0.0 }
 0x2e6   :  { %1915 = vrot.lane.b32.xlu1 %v2844_v45, %s2251_s10  ;;  %1899 = vrot.lane.b32.xlu0 %v2846_v32, %s2250_s9  ;;  %v2857_v7 = vpack.c.bf16 %v1793_v57, %v1788_v54  ;;  %v1775_v60 = vmul.f32 0.01, %v1755_v53  ;;  %vm1765_vm13 = vcmp.ge.f32.partialorder %v1755_v53, 0.0  ;;  %vm1960_vm14 = vcmask 130048  }
 0x2e7   :  { %v1790_v19 = vsel %vm1770_vm12, %v1760_v52, %v1780_v18  ;;  %2140 = vmatprep.mubr.msk.bf16.mxu0 %vm1960_vm14, %v2138_v47  ;;  %2139 = vmatprep.mubr.msk.bf16.mxu1 %vm1960_vm14, %v2138_v47 }
 0x2e8   :  { %v1785_v13 = vsel %vm1765_vm13, %v1755_v53, %v1775_v60 }
 0x2e9   :  { %v2866_v61 = vpack.c.bf16 %v1790_v19, %v1785_v13 }
 0x2ea   :  { %1917 = vrot.lane.b32.xlu1 %v2846_v32, %s2251_s10  ;;  %1903 = vrot.lane.b32.xlu0 %v1799_v59, %s2250_s9 }
 0x2ee   :  { %1919 = vrot.lane.b32.xlu1 %v2857_v7, %s2251_s10  ;;  %1879 = vrot.lane.b32.xlu0 %v2844_v45, %s2249_s8 }
 0x2f2   :  { %1921 = vrot.lane.b32.xlu1 %v1799_v59, %s2251_s10  ;;  %1883 = vrot.lane.b32.xlu0 %v2857_v7, %s2249_s8 }
 0x2f6   :  { %1913 = vrot.lane.b32.xlu1 %v2866_v61, %s2251_s10  ;;  %1877 = vrot.lane.b32.xlu0 %v2866_v61, %s2249_s8 }
 0x2fa   :  { %1897 = vrot.lane.b32.xlu1 %v2844_v45, %s2250_s9  ;;  %1863 = vrot.lane.b32.xlu0 %v2846_v32, %s2248_s30 }
 0x2fe   :  { %1901 = vrot.lane.b32.xlu1 %v2857_v7, %s2250_s9  ;;  %1867 = vrot.lane.b32.xlu0 %v1799_v59, %s2248_s30 }
 0x302   :  { %1895 = vrot.lane.b32.xlu1 %v2866_v61, %s2250_s9  ;;  %1843 = vrot.lane.b32.xlu0 %v2844_v45, %s2247_s0 }
 0x306   :  { %1881 = vrot.lane.b32.xlu1 %v2846_v32, %s2249_s8  ;;  %1847 = vrot.lane.b32.xlu0 %v2857_v7, %s2247_s0 }
 0x30a   :  { %1885 = vrot.lane.b32.xlu1 %v1799_v59, %s2249_s8  ;;  %1841 = vrot.lane.b32.xlu0 %v2866_v61, %s2247_s0 }
 0x30e   :  { %1861 = vrot.lane.b32.xlu1 %v2844_v45, %s2248_s30  ;;  %1827 = vrot.lane.b32.xlu0 %v2846_v32, %s2246_s29 }
 0x312   :  { %1865 = vrot.lane.b32.xlu1 %v2857_v7, %s2248_s30  ;;  %1831 = vrot.lane.b32.xlu0 %v1799_v59, %s2246_s29 }
 0x316   :  { %1859 = vrot.lane.b32.xlu1 %v2866_v61, %s2248_s30  ;;  %1807 = vrot.lane.b32.xlu0 %v2844_v45, %s2245_s26 }
 0x31a   :  { %1845 = vrot.lane.b32.xlu1 %v2846_v32, %s2247_s0  ;;  %1811 = vrot.lane.b32.xlu0 %v2857_v7, %s2245_s26 }
 0x31e   :  { %1849 = vrot.lane.b32.xlu1 %v1799_v59, %s2247_s0  ;;  %1805 = vrot.lane.b32.xlu0 %v2866_v61, %s2245_s26 }
 0x322   :  { %1825 = vrot.lane.b32.xlu1 %v2844_v45, %s2246_s29  ;;  %1935 = vrot.lane.b32.xlu0 %v2846_v32, %s2252_s11 }
 0x326   :  { %1829 = vrot.lane.b32.xlu1 %v2857_v7, %s2246_s29  ;;  %1939 = vrot.lane.b32.xlu0 %v1799_v59, %s2252_s11 }
 0x32a   :  { %1823 = vrot.lane.b32.xlu1 %v2866_v61, %s2246_s29  ;;  %1951 = vperm.xlu0 %2226, %v34_v62  }
 0x32e   :  { %1809 = vrot.lane.b32.xlu1 %v2846_v32, %s2245_s26 }
 0x332   :  { %1813 = vrot.lane.b32.xlu1 %v1799_v59, %s2245_s26 }
 0x336   :  { %1933 = vrot.lane.b32.xlu1 %v2844_v45, %s2252_s11 }
 0x33a   :  { %1937 = vrot.lane.b32.xlu1 %v2857_v7, %s2252_s11 }
 0x33e   :  { %1931 = vrot.lane.b32.xlu1 %v2866_v61, %s2252_s11 }
 0x358   :  { %v1916_v22 = vpop.permute.xlu1 %1915  ;;  %v1900_v63 = vpop.permute.xlu0 %1899 }
 0x35c   :  { %v1918_v0 = vpop.permute.xlu1 %1917  ;;  %v1904_v58 = vpop.permute.xlu0 %1903 }
 0x35d   :  { %v1924_v31 = vsel %vm1292_vm9, %v1916_v22, %v1918_v0 }
 0x35e   :  { %1964 = vmatprep.subr.bf16.mxu1 %v1924_v31 }
 0x360   :  { %v1920_v56 = vpop.permute.xlu1 %1919  ;;  %v1880_v2 = vpop.permute.xlu0 %1879 }
 0x361   :  { %v1925_v9 = vsel %vm1292_vm9, %v1918_v0, %v1920_v56 }
 0x364   :  { %v1922_v34 = vpop.permute.xlu1 %1921  ;;  %v1884_v23 = vpop.permute.xlu0 %1883 }
 0x365   :  { %v1926_v1 = vsel %vm1292_vm9, %v1920_v56, %v1922_v34 }
 0x366   :  { %2005 = vmatprep.subr.bf16.mxu0 %v1926_v1 }
 0x367   :  { %2006 = vmatpush1.bf16.msra.mxu0 %v1925_v9  ;;  %v2137_v9 = vcombine.low %v2925_v39, %v2925_v39 }
 0x368   :  { %v1914_v10 = vpop.permute.xlu1 %1913  ;;  %v1878_v27 = vpop.permute.xlu0 %1877 }
 0x369   :  { %v1923_v15 = vsel %vm1292_vm9, %v1914_v10, %v1916_v22  ;;  %v1887_v21 = vsel %vm936_vm7, %v1878_v27, %v1880_v2 }
 0x36a   :  { %1965 = vmatpush1.bf16.msra.mxu1 %v1923_v15 }
 0x36c   :  { %v1898_v46 = vpop.permute.xlu1 %1897  ;;  %v1864_v3 = vpop.permute.xlu0 %1863 }
 0x36d   :  { %v1906_v5 = vsel %vm1114_vm8, %v1898_v46, %v1900_v63 }
 0x36e   :  { %1966 = vmatprep.subr.bf16.mxu1 %v1906_v5 }
 0x370   :  { %v1902_v6 = vpop.permute.xlu1 %1901  ;;  %v1868_v14 = vpop.permute.xlu0 %1867 }
 0x371   :  { %v1907_v24 = vsel %vm1114_vm8, %v1900_v63, %v1902_v6  ;;  %v1908_v12 = vsel %vm1114_vm8, %v1902_v6, %v1904_v58 }
 0x372   :  { %2007 = vmatprep.subr.bf16.mxu0 %v1908_v12 }
 0x373   :  { %2008 = vmatpush1.bf16.msra.mxu0 %v1907_v24 }
 0x374   :  { %v1896_v16 = vpop.permute.xlu1 %1895  ;;  %v1844_v33 = vpop.permute.xlu0 %1843 }
 0x375   :  { %v1905_v36 = vsel %vm1114_vm8, %v1896_v16, %v1898_v46 }
 0x376   :  { %1967 = vmatpush1.bf16.msra.mxu1 %v1905_v36 }
 0x378   :  { %v1882_v17 = vpop.permute.xlu1 %1881  ;;  %v1848_v37 = vpop.permute.xlu0 %1847 }
 0x379   :  { %v1888_v55 = vsel %vm936_vm7, %v1880_v2, %v1882_v17  ;;  %v1889_v49 = vsel %vm936_vm7, %v1882_v17, %v1884_v23 }
 0x37a   :  { %1968 = vmatprep.subr.bf16.mxu1 %v1888_v55 }
 0x37b   :  { %1969 = vmatpush1.bf16.msra.mxu1 %v1887_v21 }
 0x37c   :  { %v1886_v20 = vpop.permute.xlu1 %1885  ;;  %v1842_v8 = vpop.permute.xlu0 %1841 }
 0x37d   :  { %v1890_v25 = vsel %vm936_vm7, %v1884_v23, %v1886_v20  ;;  %v1851_v44 = vsel %vm580_vm5, %v1842_v8, %v1844_v33 }
 0x37e   :  { %2009 = vmatprep.subr.bf16.mxu0 %v1890_v25 }
 0x37f   :  { %2010 = vmatpush1.bf16.msra.mxu0 %v1889_v49 }
 0x380   :  { %v1862_v30 = vpop.permute.xlu1 %1861  ;;  %v1828_v38 = vpop.permute.xlu0 %1827 }
 0x381   :  { %v1870_v48 = vsel %vm758_vm6, %v1862_v30, %v1864_v3 }
 0x382   :  { %1970 = vmatprep.subr.bf16.mxu1 %v1870_v48 }
 0x384   :  { %v1866_v26 = vpop.permute.xlu1 %1865  ;;  %v1832_v42 = vpop.permute.xlu0 %1831 }
 0x385   :  { %v1871_v28 = vsel %vm758_vm6, %v1864_v3, %v1866_v26  ;;  %v1872_v40 = vsel %vm758_vm6, %v1866_v26, %v1868_v14 }
 0x386   :  { %2011 = vmatprep.subr.bf16.mxu0 %v1872_v40 }
 0x387   :  { %2012 = vmatpush1.bf16.msra.mxu0 %v1871_v28 }
 0x388   :  { %v1860_v11 = vpop.permute.xlu1 %1859  ;;  %v1808_v51 = vpop.permute.xlu0 %1807 }
 0x389   :  { %v1869_v29 = vsel %vm758_vm6, %v1860_v11, %v1862_v30 }
 0x38a   :  { %1971 = vmatpush1.bf16.msra.mxu1 %v1869_v29 }
 0x38c   :  { %v1846_v41 = vpop.permute.xlu1 %1845  ;;  %v1812_v53 = vpop.permute.xlu0 %1811 }
 0x38d   :  { %v1852_v4 = vsel %vm580_vm5, %v1844_v33, %v1846_v41  ;;  %v1853_v50 = vsel %vm580_vm5, %v1846_v41, %v1848_v37 }
 0x38e   :  { %1972 = vmatprep.subr.bf16.mxu1 %v1852_v4 }
 0x38f   :  { %1973 = vmatpush1.bf16.msra.mxu1 %v1851_v44 }
 0x390   :  { %v1850_v43 = vpop.permute.xlu1 %1849  ;;  %v1806_v13 = vpop.permute.xlu0 %1805 }
 0x391   :  { %v1854_v35 = vsel %vm580_vm5, %v1848_v37, %v1850_v43  ;;  %v1815_v22 = vsel %vm82_vm0, %v1806_v13, %v1808_v51 }
 0x392   :  { %2013 = vmatprep.subr.bf16.mxu0 %v1854_v35 }
 0x393   :  { %2014 = vmatpush1.bf16.msra.mxu0 %v1853_v50 }
 0x394   :  { %v1826_v52 = vpop.permute.xlu1 %1825  ;;  %v1936_v58 = vpop.permute.xlu0 %1935 }
 0x395   :  { %v1834_v57 = vsel %vm402_vm4, %v1826_v52, %v1828_v38 }
 0x396   :  { %1974 = vmatprep.subr.bf16.mxu1 %v1834_v57 }
 0x398   :  { %v1830_v59 = vpop.permute.xlu1 %1829  ;;  %v1940_v34 = vpop.permute.xlu0 %1939 }
 0x399   :  { %v1835_v54 = vsel %vm402_vm4, %v1828_v38, %v1830_v59  ;;  %v1836_v18 = vsel %vm402_vm4, %v1830_v59, %v1832_v42 }
 0x39a   :  { %2015 = vmatprep.subr.bf16.mxu0 %v1836_v18 }
 0x39b   :  { %2016 = vmatpush1.bf16.msra.mxu0 %v1835_v54 }
 0x39c   :  { %v1824_v60 = vpop.permute.xlu1 %1823 }
 0x39d   :  { %v1833_v19 = vsel %vm402_vm4, %v1824_v60, %v1826_v52 }
 0x39e   :  { %1975 = vmatpush1.bf16.msra.mxu1 %v1833_v19 }
 0x3a0   :  { %v1810_v62 = vpop.permute.xlu1 %1809 }
 0x3a1   :  { %v1816_v47 = vsel %vm82_vm0, %v1808_v51, %v1810_v62  ;;  %v1817_v31 = vsel %vm82_vm0, %v1810_v62, %v1812_v53 }
 0x3a2   :  { %1976 = vmatprep.subr.bf16.mxu1 %v1816_v47 }
 0x3a3   :  { %1977 = vmatpush1.bf16.msra.mxu1 %v1815_v22 }
 0x3a4   :  { %1978 = vmatprep.subr.bf16.mxu1 %v2844_v45  ;;  %v1814_v63 = vpop.permute.xlu1 %1813 }
 0x3a5   :  { %v1818_v0 = vsel %vm82_vm0, %v1812_v53, %v1814_v63  ;;  %v1952_v10 = vpop.permute.xlu0 %1951 }
 0x3a6   :  { %2017 = vmatprep.subr.bf16.mxu0 %v1818_v0 }
 0x3a7   :  { %1979 = vmatpush1.bf16.msra.mxu1 %v2866_v61  ;;  %2018 = vmatpush1.bf16.msra.mxu0 %v1817_v31 }
 0x3a8   :  { %2019 = vmatprep.subr.bf16.mxu0 %v2857_v7  ;;  %v1934_v56 = vpop.permute.xlu1 %1933 }
 0x3a9   :  { %v1942_v2 = vsel %vm1470_vm10, %v1934_v56, %v1936_v58 }
 0x3aa   :  { %1994 = vmatprep.subr.bf16.mxu1 %v1942_v2 }
 0x3ab   :  { %2020 = vmatpush1.bf16.msra.mxu0 %v2846_v32 }
 0x3ac   :  { %v1938_v45 = vpop.permute.xlu1 %1937 }
 0x3ad   :  { %v1943_v23 = vsel %vm1470_vm10, %v1936_v58, %v1938_v45  ;;  %v1944_v1 = vsel %vm1470_vm10, %v1938_v45, %v1940_v34 }
 0x3ae   :  { %2035 = vmatprep.subr.bf16.mxu0 %v1944_v1 }
 0x3af   :  { %2036 = vmatpush2.bf16.msra.mxu0 %v1943_v23 }
 0x3b0   :  { %v1932_v61 = vpop.permute.xlu1 %1931 }
 0x3b1   :  { %v1941_v7 = vsel %vm1470_vm10, %v1932_v61, %v1934_v56 }
 0x3b2   :  { %1995 = vmatpush2.bf16.msra.mxu1 %v1941_v7  ;;  %2038 = vmatmul.mubr.bf16.vlgmr.msra.gmra.mxu0 %v2137_v9 }
 0x3b5   :  { %1997 = vmatmul.mubr.bf16.vlgmr.msra.gmra.mxu1 %v2137_v9 }
 0x472   :  { %v2039_v27 = vpop.f32.mrf.mxu0 }
 0x473   :  { %v2040_v32 = vadd.f32 %v2039_v27, %v1952_v10 }
 0x474   :  { %v2041_v15 = vpop.f32.mrf.mxu0 }
 0x475   :  { %vm2048_vm0 = vcmp.ge.f32.partialorder %v2040_v32, 0.0  ;;  %v2052_v46 = vmul.f32 0.01, %v2040_v32  ;;  %v2042_v3 = vadd.f32 %v2041_v15, %v1952_v10  ;;  %v1998_v5 = vpop.f32.mrf.mxu1 }
 0x476   :  { %v1999_v6 = vadd.f32 %v1998_v5, %v1952_v10  ;;  %v2043_v14 = vpop.f32.mrf.mxu0 }
 0x477   :  { %v2056_v24 = vsel %vm2048_vm0, %v2040_v32, %v2052_v46  ;;  %vm2049_vm4 = vcmp.ge.f32.partialorder %v2042_v3, 0.0  ;;  %v2053_v39 = vmul.f32 0.01, %v2042_v3  ;;  %v2000_v12 = vpop.f32.mrf.mxu1 }
 0x478   :  { %2060 = vst [vmem:[%s2993_s7 + $0x10] sm:$0xff] %v2056_v24  ;;  %vm2046_vm5 = vcmp.ge.f32.partialorder %v1999_v6, 0.0  ;;  %v2050_v16 = vmul.f32 0.01, %v1999_v6  ;;  %v2001_v33 = vadd.f32 %v2000_v12, %v1952_v10  ;;  %v2044_v36 = vpop.f32.mrf.mxu0 }
 0x479   :  { %v2057_v17 = vsel %vm2049_vm4, %v2042_v3, %v2053_v39  ;;  %v2002_v55 = vpop.f32.mrf.mxu1 }
 0x47a   :  { %2061 = vst [vmem:[%s2993_s7 + $0x18] sm:$0xff] %v2057_v17  ;;  %v2054_v21 = vsel %vm2046_vm5, %v1999_v6, %v2050_v16  ;;  %vm2047_vm6 = vcmp.ge.f32.partialorder %v2001_v33, 0.0  ;;  %v2051_v37 = vmul.f32 0.01, %v2001_v33 }
 0x47b   :  { %2058 = vst [vmem:[%s2993_s7] sm:$0xff] %v2054_v21  ;;  %v2003_v20 = vpop.f32.mrf.mxu1 }
 0x47c   :  { %v2055_v25 = vsel %vm2047_vm6, %v2001_v33, %v2051_v37 }
 0x47d   :  { %2059 = vst [vmem:[%s2993_s7 + $0x8] sm:$0xff] %v2055_v25 }

</bundles_post_ra>
